<compile_context>
chip_gen: v6e
topology: v6e:2x2x1
jax: 0.10.0
libtpu: 0.0.40
codegen_flags: <defaults>
</compile_context>

<pallas_src>
import functools

import jax
import jax.numpy as jnp
from jax.experimental import pallas as pl
from jax.experimental.pallas import tpu as pltpu

_PARALLEL = pltpu.CompilerParams(dimension_semantics=("parallel",))
_EPS = 1e-5


# ----------------------------- tiling helper ------------------------------- #

def _round8(n):
    return ((n + 7) // 8) * 8


def _row_tile(m, width, budget_bytes=2 << 20):
    """Row-tile: multiple of 8, ~budget_bytes per (tm, width) f32 tile."""
    tm = budget_bytes // (4 * max(width, 1))
    tm = max(8, min(tm, 4096, _round8(m)))
    return (tm // 8) * 8


# ----------------------------- Pallas kernels ------------------------------ #

def _matmul_bias_relu_kernel(x_ref, w_ref, b_ref, o_ref):
    y = jnp.dot(x_ref[...], w_ref[...], preferred_element_type=jnp.float32)
    o_ref[...] = jnp.maximum(y + b_ref[...], 0.0)


def matmul_bias_relu(x, w, b):
    """relu(X @ W + b), row-tiled, parallel grid."""
    M, K = x.shape
    N = w.shape[1]
    tm = _row_tile(M, max(K, N))
    return pl.pallas_call(
        _matmul_bias_relu_kernel,
        out_shape=jax.ShapeDtypeStruct((M, N), jnp.float32),
        grid=(pl.cdiv(M, tm),),
        in_specs=[pl.BlockSpec((tm, K), lambda i: (i, 0)),
                  pl.BlockSpec((K, N), lambda i: (0, 0)),
                  pl.BlockSpec((1, N), lambda i: (0, 0))],
        out_specs=pl.BlockSpec((tm, N), lambda i: (i, 0)),
        compiler_params=_PARALLEL,
    )(x, w, b.reshape(1, N))


def _matmul_kernel(x_ref, w_ref, o_ref):
    o_ref[...] = jnp.dot(x_ref[...], w_ref[...],
                         preferred_element_type=jnp.float32)


def matmul(x, w):
    """X @ W (no bias: conv bias cancels under batch-stat BN), row-tiled."""
    M, K = x.shape
    N = w.shape[1]
    tm = _row_tile(M, max(K, N))
    return pl.pallas_call(
        _matmul_kernel,
        out_shape=jax.ShapeDtypeStruct((M, N), jnp.float32),
        grid=(pl.cdiv(M, tm),),
        in_specs=[pl.BlockSpec((tm, K), lambda i: (i, 0)),
                  pl.BlockSpec((K, N), lambda i: (0, 0))],
        out_specs=pl.BlockSpec((tm, N), lambda i: (i, 0)),
        compiler_params=_PARALLEL,
    )(x, w)


def _stats_kernel(x_ref, st_ref, *, m_total):
    tm = x_ref.shape[0]
    rows = (jax.lax.broadcasted_iota(jnp.int32, (tm, 1), 0)
            + pl.program_id(0) * tm)
    x = jnp.where(rows < m_total, x_ref[...], 0.0)   # mask padded tail rows
    s = jnp.sum(x, axis=0, keepdims=True)
    sq = jnp.sum(x * x, axis=0, keepdims=True)
    st_ref[...] = jnp.concatenate([s, sq], axis=0)[None]


def channel_stats(x):
    """Per-channel (sum, sumsq) over rows of an (M, C) slab -> (2, C)."""
    M, C = x.shape
    tm = _row_tile(M, C)
    g = pl.cdiv(M, tm)
    partial = pl.pallas_call(
        functools.partial(_stats_kernel, m_total=M),
        out_shape=jax.ShapeDtypeStruct((g, 2, C), jnp.float32),
        grid=(g,),
        in_specs=[pl.BlockSpec((tm, C), lambda i: (i, 0))],
        out_specs=pl.BlockSpec((1, 2, C), lambda i: (i, 0, 0)),
        compiler_params=_PARALLEL,
    )(x)
    return jnp.sum(partial, axis=0)          # tiny XLA fold over grid tiles


def _bnrelu_matmul_stats_kernel(x_ref, a_ref, s_ref, w_ref, taps_ref, st_ref,
                                *, m_total):
    tm = x_ref.shape[0]
    rows = (jax.lax.broadcasted_iota(jnp.int32, (tm, 1), 0)
            + pl.program_id(0) * tm)
    y = jnp.maximum(x_ref[...] * a_ref[...] + s_ref[...], 0.0)
    y = jnp.where(rows < m_total, y, 0.0)    # padded rows contribute 0 to stats
    t = jnp.dot(y, w_ref[...], preferred_element_type=jnp.float32)
    taps_ref[...] = t
    s = jnp.sum(t, axis=0, keepdims=True)
    sq = jnp.sum(t * t, axis=0, keepdims=True)
    st_ref[...] = jnp.concatenate([s, sq], axis=0)[None]


def bn_relu_matmul_stats(x, a, sft, w):
    """(BN-normalize + ReLU) -> taps = y @ W, plus per-tile (sum, sumsq) of
    the taps so the next BN never re-reads the tap slab."""
    M, C = x.shape
    N = w.shape[1]
    tm = _row_tile(M, max(C, N))
    g = pl.cdiv(M, tm)
    return pl.pallas_call(
        functools.partial(_bnrelu_matmul_stats_kernel, m_total=M),
        out_shape=(jax.ShapeDtypeStruct((M, N), jnp.float32),
                   jax.ShapeDtypeStruct((g, 2, N), jnp.float32)),
        grid=(g,),
        in_specs=[pl.BlockSpec((tm, C), lambda i: (i, 0)),
                  pl.BlockSpec((1, C), lambda i: (0, 0)),
                  pl.BlockSpec((1, C), lambda i: (0, 0)),
                  pl.BlockSpec((C, N), lambda i: (0, 0))],
        out_specs=(pl.BlockSpec((tm, N), lambda i: (i, 0)),
                   pl.BlockSpec((1, 2, N), lambda i: (i, 0, 0))),
        compiler_params=_PARALLEL,
    )(x, a.reshape(1, C), sft.reshape(1, C), w)


def _bnrelu_matmul_tanh_kernel(x_ref, a_ref, s_ref, w_ref, b_ref, o_ref):
    y = jnp.maximum(x_ref[...] * a_ref[...] + s_ref[...], 0.0)
    o_ref[...] = jnp.tanh(
        jnp.dot(y, w_ref[...], preferred_element_type=jnp.float32) + b_ref[...])


def bn_relu_matmul_tanh(x, a, sft, w, b):
    """(BN-normalize + ReLU) -> tanh(y @ W + b); the out deconv fused in."""
    M, C = x.shape
    N = w.shape[1]
    tm = _row_tile(M, max(C, N))
    return pl.pallas_call(
        _bnrelu_matmul_tanh_kernel,
        out_shape=jax.ShapeDtypeStruct((M, N), jnp.float32),
        grid=(pl.cdiv(M, tm),),
        in_specs=[pl.BlockSpec((tm, C), lambda i: (i, 0)),
                  pl.BlockSpec((1, C), lambda i: (0, 0)),
                  pl.BlockSpec((1, C), lambda i: (0, 0)),
                  pl.BlockSpec((C, N), lambda i: (0, 0)),
                  pl.BlockSpec((1, N), lambda i: (0, 0))],
        out_specs=pl.BlockSpec((tm, N), lambda i: (i, 0)),
        compiler_params=_PARALLEL,
    )(x, a.reshape(1, C), sft.reshape(1, C), w, b.reshape(1, N))


# ------------------------------ JAX glue ----------------------------------- #
# TODO(synk): the K=3/stride-2 overlap-add interleave and the final
# pixel-shuffle/view are thin XLA reshape/pad/transpose glue (no clean
# rectangular-tile Pallas equivalent); all arithmetic stays in kernels.

def _overlap_interleave_3x2(taps, B, H, W, C):
    """K=3, stride=2 ConvTranspose assembly -> (B, 2H+1, 2W+1, C)."""
    t = taps.reshape(B, H, W, 3, 3, C)

    def pad(a, top, bot, left, right):
        return jnp.pad(a, ((0, 0), (top, bot), (left, right), (0, 0)))

    ee = (pad(t[:, :, :, 0, 0], 0, 1, 0, 1) + pad(t[:, :, :, 0, 2], 0, 1, 1, 0)
          + pad(t[:, :, :, 2, 0], 1, 0, 0, 1) + pad(t[:, :, :, 2, 2], 1, 0, 1, 0))
    eo = pad(t[:, :, :, 0, 1], 0, 1, 0, 1) + pad(t[:, :, :, 2, 1], 1, 0, 0, 1)
    oe = pad(t[:, :, :, 1, 0], 0, 1, 0, 1) + pad(t[:, :, :, 1, 2], 0, 1, 1, 0)
    oo = pad(t[:, :, :, 1, 1], 0, 1, 0, 1)

    row_even = jnp.stack([ee, eo], axis=3)            # (B, H+1, W+1, 2, C)
    row_odd = jnp.stack([oe, oo], axis=3)
    full = jnp.stack([row_even, row_odd], axis=2)     # (B, H+1, 2, W+1, 2, C)
    full = full.reshape(B, 2 * (H + 1), 2 * (W + 1), C)
    return full[:, :2 * H + 1, :2 * W + 1, :]


def init_params(key, hidden, img_size):
    s = img_size // 8
    c4, c2, c1 = 4 * hidden, 2 * hidden, hidden
    ks = jax.random.split(key, 8)

    def u(k, shape, fan_in):
        bound = 1.0 / float(fan_in) ** 0.5
        return jax.random.uniform(k, shape, jnp.float32, -bound, bound)

    # prepro Linear(4H -> s^2 * 4H); fold NCHW->NHWC into the weight columns
    # (column order c,h,w -> h,w,c) so the post-matmul reshape is a free view.
    w0 = u(ks[0], (c4, s * s * c4), c4)
    b0 = u(ks[1], (s * s * c4,), c4)
    w0p = w0.reshape(c4, c4, s, s).transpose(0, 2, 3, 1).reshape(c4, s * s * c4)
    b0p = b0.reshape(c4, s, s).transpose(1, 2, 0).reshape(s * s * c4)

    # Raw PyTorch-layout deconv weights (Cin, Cout, K, K), merged to
    # (Cin, K*K*Cout) so each deconv is a single matmul (tap-major columns).
    w1 = u(ks[2], (c4, c2, 3, 3), c4 * 9)
    w2 = u(ks[4], (c2, c1, 2, 2), c2 * 4)
    w3 = u(ks[6], (c1, 1, 2, 2), c1 * 4)
    w3m = jnp.transpose(w3, (0, 2, 3, 1)).reshape(c1, 4)
    # Block-diagonal out weight: applies the (c1 -> 4) out deconv per layer2
    # tap, so the layer2 activation never has to be assembled / stored.
    wbd = jnp.kron(jnp.eye(4, dtype=jnp.float32), w3m)          # (4*c1, 16)

    return dict(
        w0=w0p, b0=b0p,
        # layer1: ConvTranspose2d(4H, 2H, 3, stride=2) + BN
        w1m=jnp.transpose(w1, (0, 2, 3, 1)).reshape(c4, 9 * c2),
        b1=u(ks[3], (c2,), c4 * 9),   # cancels exactly under batch-stat BN
        g1=jnp.ones((c2,), jnp.float32),
        be1=jnp.zeros((c2,), jnp.float32),
        # layer2: ConvTranspose2d(2H, H, 2, stride=2) + BN
        w2m=jnp.transpose(w2, (0, 2, 3, 1)).reshape(c2, 4 * c1),
        b2=u(ks[5], (c1,), c2 * 4),   # cancels exactly under batch-stat BN
        g2=jnp.ones((c1,), jnp.float32),
        be2=jnp.zeros((c1,), jnp.float32),
        # out: ConvTranspose2d(H, 1, 2, stride=2) + Tanh
        wbd=wbd,
        b3bd=jnp.tile(u(ks[7], (1,), c1 * 4), 16),
    )


def generator_forward(params, noise, hidden, img_size):
    B = noise.shape[0]
    s = img_size // 8
    c4, c2, c1 = 4 * hidden, 2 * hidden, hidden

    # ---- prepro: Linear + ReLU (1 launch); output already NHWC-ordered ----
    y = matmul_bias_relu(noise, params["w0"], params["b0"])   # (B, s*s*c4)
    x2d = y.reshape(B * s * s, c4)                            # free view

    # ---- layer1: ConvT(4H->2H, K=3, s=2) taps (1 launch) + interleave ----
    taps1 = matmul(x2d, params["w1m"])                        # (B*s*s, 9*c2)
    x = _overlap_interleave_3x2(taps1, B, s, s, c2)           # (B, 2s+1, 2s+1, c2)
    H1 = W1 = 2 * s + 1
    M1 = B * H1 * W1
    x2d = x.reshape(M1, c2)

    # ---- layer1 BN stats (1 launch) -> scale/shift (tiny XLA) ----
    st1 = channel_stats(x2d)                                  # (2, c2)
    mean1 = st1[0] / M1
    var1 = jnp.maximum(st1[1] / M1 - mean1 * mean1, 0.0)
    a1 = params["g1"] * jax.lax.rsqrt(var1 + _EPS)
    sft1 = params["be1"] - mean1 * a1

    # ---- layer1 BN+ReLU fused with layer2 ConvT(2H->H, K=2, s=2) taps,
    #      emitting layer2 partial BN stats in the same pass (1 launch) ----
    taps2, pstats2 = bn_relu_matmul_stats(x2d, a1, sft1, params["w2m"])
    st2 = jnp.sum(pstats2, axis=0).reshape(2, 4, c1).sum(axis=1)   # fold taps
    n2 = 4.0 * M1          # taps never overlap when stride == K
    mean2 = st2[0] / n2
    var2 = jnp.maximum(st2[1] / n2 - mean2 * mean2, 0.0)
    a2 = params["g2"] * jax.lax.rsqrt(var2 + _EPS)
    sft2 = params["be2"] - mean2 * a2
    a2f, sft2f = jnp.tile(a2, 4), jnp.tile(sft2, 4)           # per-tap bcast

    # ---- layer2 BN+ReLU fused with out ConvT(H->1, K=2, s=2) + Tanh
    #      (block-diagonal weight -> 16-lane output, 1 launch) ----
    out_taps = bn_relu_matmul_tanh(taps2, a2f, sft2f,
                                   params["wbd"], params["b3bd"])  # (M1, 16)

    # ---- compose both stride-2 pixel shuffles on the 1-channel output ----
    t = out_taps.reshape(B, H1, W1, 2, 2, 2, 2)     # (b,h,w,ki1,kj1,ki2,kj2)
    img = t.transpose(0, 1, 3, 5, 2, 4, 6).reshape(B, 4 * H1, 4 * W1)
    img = img[:, None, :, :]                        # NCHW, 1 channel

    # replicate PyTorch: img.view(-1, 1, img_size, img_size)
    return img.reshape(-1, 1, img_size, img_size)


if __name__ == "__main__":
    # batch chosen so the final view(-1, 1, img_size, img_size) divides evenly
    hidden, img_size, batch = 8, 16, 16
    key = jax.random.PRNGKey(0)
    pkey, nkey = jax.random.split(key)
    params = init_params(pkey, hidden, img_size)
    noise = jax.random.normal(nkey, (batch, 4 * hidden), jnp.float32)

    fwd = jax.jit(functools.partial(generator_forward,
                                    hidden=hidden, img_size=img_size))
    out = jax.block_until_ready(fwd(params, noise))

    spatial = 8 * (img_size // 8) + 4
    assert out.shape == (batch * spatial ** 2 // img_size ** 2,
                         1, img_size, img_size), out.shape
    assert bool(jnp.all(jnp.isfinite(out)))
    print("KERNEL_OK")
</pallas_src>

<mosaic_0001>
module attributes {stable_mosaic.version = 11 : i64} {
  func.func @_matmul_kernel(%arg0: i32, %arg1: memref<64x32xf32, #tpu.memory_space<vmem>>, %arg2: memref<32x144xf32, #tpu.memory_space<vmem>>, %arg3: memref<64x144xf32, #tpu.memory_space<vmem>>) attributes {dimension_semantics = [#tpu.dimension_semantics<parallel>], iteration_bounds = array<i64: 1>, scalar_prefetch = 0 : i64, scratch_operands = 0 : i64, tpu.core_type = #tpu.core_type<tc>, window_params = [{transform_indices = @transform_0, window_bounds = array<i64: 64, 32>}, {pipeline_mode = #tpu.pipeline_mode<synchronous>, transform_indices = @transform_1, window_bounds = array<i64: 32, 144>}, {transform_indices = @transform_2, window_bounds = array<i64: 64, 144>}]} {
    %c0 = arith.constant 0 : index
    %c0_0 = arith.constant 0 : index
    %0 = vector.load %arg1[%c0, %c0_0] : memref<64x32xf32, #tpu.memory_space<vmem>>, vector<64x32xf32>
    %c0_1 = arith.constant 0 : index
    %c0_2 = arith.constant 0 : index
    %1 = vector.load %arg2[%c0_1, %c0_2] : memref<32x144xf32, #tpu.memory_space<vmem>>, vector<32x144xf32>
    %cst = arith.constant dense<0.000000e+00> : vector<64x144xf32>
    %2 = tpu.matmul %0, %1, %cst {dimension_numbers = #tpu.dot_dimension_numbers<[1], [0], [0], [1], [0, 0, 1, 1], [], []>} : vector<64x32xf32>, vector<32x144xf32>, vector<64x144xf32> -> vector<64x144xf32>
    %c0_3 = arith.constant 0 : index
    %c0_4 = arith.constant 0 : index
    %3 = vector.load %arg3[%c0_3, %c0_4] : memref<64x144xf32, #tpu.memory_space<vmem>>, vector<64x144xf32>
    tpu.vector_store %arg3[%c0_3, %c0_4], %2 {strides = array<i32>} : memref<64x144xf32, #tpu.memory_space<vmem>>, vector<64x144xf32>,
    return
  }
  func.func @transform_0(%arg0: i32) -> (i32, i32) {
    %c0_i32 = arith.constant 0 : i32
    %c0_i32_0 = arith.constant 0 : i32
    return %arg0, %c0_i32 : i32, i32
  }
  func.func @transform_1(%arg0: i32) -> (i32, i32) {
    %c0_i32 = arith.constant 0 : i32
    %c0_i32_0 = arith.constant 0 : i32
    %c0_i32_1 = arith.constant 0 : i32
    return %c0_i32, %c0_i32_0 : i32, i32
  }
  func.func @transform_2(%arg0: i32) -> (i32, i32) {
    %c0_i32 = arith.constant 0 : i32
    %c0_i32_0 = arith.constant 0 : i32
    return %arg0, %c0_i32 : i32, i32
  }
}

module attributes {stable_mosaic.version = 11 : i64} {
  func.func @_matmul_bias_relu_kernel(%arg0: i32, %arg1: memref<16x32xf32, #tpu.memory_space<vmem>>, %arg2: memref<32x128xf32, #tpu.memory_space<vmem>>, %arg3: memref<1x128xf32, #tpu.memory_space<vmem>>, %arg4: memref<16x128xf32, #tpu.memory_space<vmem>>) attributes {dimension_semantics = [#tpu.dimension_semantics<parallel>], iteration_bounds = array<i64: 1>, scalar_prefetch = 0 : i64, scratch_operands = 0 : i64, tpu.core_type = #tpu.core_type<tc>, window_params = [{transform_indices = @transform_0, window_bounds = array<i64: 16, 32>}, {pipeline_mode = #tpu.pipeline_mode<synchronous>, transform_indices = @transform_1, window_bounds = array<i64: 32, 128>}, {pipeline_mode = #tpu.pipeline_mode<synchronous>, transform_indices = @transform_2, window_bounds = array<i64: 1, 128>}, {transform_indices = @transform_3, window_bounds = array<i64: 16, 128>}]} {
    %c0 = arith.constant 0 : index
    %c0_0 = arith.constant 0 : index
    %0 = vector.load %arg1[%c0, %c0_0] : memref<16x32xf32, #tpu.memory_space<vmem>>, vector<16x32xf32>
    %c0_1 = arith.constant 0 : index
    %c0_2 = arith.constant 0 : index
    %1 = vector.load %arg2[%c0_1, %c0_2] : memref<32x128xf32, #tpu.memory_space<vmem>>, vector<32x128xf32>
    %cst = arith.constant dense<0.000000e+00> : vector<16x128xf32>
    %2 = tpu.matmul %0, %1, %cst {dimension_numbers = #tpu.dot_dimension_numbers<[1], [0], [0], [1], [0, 0, 1, 1], [], []>} : vector<16x32xf32>, vector<32x128xf32>, vector<16x128xf32> -> vector<16x128xf32>
    %c0_3 = arith.constant 0 : index
    %c0_4 = arith.constant 0 : index
    %3 = vector.load %arg3[%c0_3, %c0_4] : memref<1x128xf32, #tpu.memory_space<vmem>>, vector<1x128xf32>
    %4 = vector.broadcast %3 : vector<1x128xf32> to vector<16x128xf32>
    %5 = arith.addf %2, %4 : vector<16x128xf32>
    %cst_5 = arith.constant 0.000000e+00 : f32
    %6 = vector.broadcast %cst_5 : f32 to vector<16x128xf32>
    %7 = arith.maximumf %5, %6 : vector<16x128xf32>
    %c0_6 = arith.constant 0 : index
    %c0_7 = arith.constant 0 : index
    %8 = vector.load %arg4[%c0_6, %c0_7] : memref<16x128xf32, #tpu.memory_space<vmem>>, vector<16x128xf32>
    tpu.vector_store %arg4[%c0_6, %c0_7], %7 {strides = array<i32>} : memref<16x128xf32, #tpu.memory_space<vmem>>, vector<16x128xf32>,
    return
  }
  func.func @transform_0(%arg0: i32) -> (i32, i32) {
    %c0_i32 = arith.constant 0 : i32
    %c0_i32_0 = arith.constant 0 : i32
    return %arg0, %c0_i32 : i32, i32
  }
  func.func @transform_1(%arg0: i32) -> (i32, i32) {
    %c0_i32 = arith.constant 0 : i32
    %c0_i32_0 = arith.constant 0 : i32
    %c0_i32_1 = arith.constant 0 : i32
    return %c0_i32, %c0_i32_0 : i32, i32
  }
  func.func @transform_2(%arg0: i32) -> (i32, i32) {
    %c0_i32 = arith.constant 0 : i32
    %c0_i32_0 = arith.constant 0 : i32
    %c0_i32_1 = arith.constant 0 : i32
    return %c0_i32, %c0_i32_0 : i32, i32
  }
  func.func @transform_3(%arg0: i32) -> (i32, i32) {
    %c0_i32 = arith.constant 0 : i32
    %c0_i32_0 = arith.constant 0 : i32
    return %arg0, %c0_i32 : i32, i32
  }
}

module attributes {stable_mosaic.version = 11 : i64} {
  func.func @_stats_kernel(%arg0: i32, %arg1: memref<400x16xf32, #tpu.memory_space<vmem>>, %arg2: memref<1x2x16xf32, #tpu.memory_space<vmem>>) attributes {dimension_semantics = [#tpu.dimension_semantics<parallel>], iteration_bounds = array<i64: 1>, scalar_prefetch = 0 : i64, scratch_operands = 0 : i64, tpu.core_type = #tpu.core_type<tc>, window_params = [{transform_indices = @transform_0, window_bounds = array<i64: 400, 16>}, {transform_indices = @transform_1, window_bounds = array<i64: 1, 2, 16>}]} {
    %0 = tpu.iota {dimensions = array<i32: 0>} : vector<400x1xi32>
    %c400_i32 = arith.constant 400 : i32
    %1 = arith.muli %arg0, %c400_i32 : i32
    %2 = vector.broadcast %1 : i32 to vector<400x1xi32>
    %3 = arith.addi %0, %2 : vector<400x1xi32>
    %c400_i32_0 = arith.constant 400 : i32
    %4 = vector.broadcast %c400_i32_0 : i32 to vector<400x1xi32>
    %5 = arith.cmpi slt, %3, %4 : vector<400x1xi32>
    %c0 = arith.constant 0 : index
    %c0_1 = arith.constant 0 : index
    %6 = vector.load %arg1[%c0, %c0_1] : memref<400x16xf32, #tpu.memory_space<vmem>>, vector<400x16xf32>
    %cst = arith.constant 0.000000e+00 : f32
    %7 = vector.shape_cast %5 : vector<400x1xi1> to vector<400x1xi1>
    %8 = vector.broadcast %7 : vector<400x1xi1> to vector<400x16xi1>
    %9 = vector.broadcast %cst : f32 to vector<400x16xf32>
    %10 = arith.select %8, %6, %9 : vector<400x16xi1>, vector<400x16xf32>
    %cst_2 = arith.constant dense<0.000000e+00> : vector<16xf32>
    %11 = vector.multi_reduction <add>, %10, %cst_2 [0] : vector<400x16xf32> to vector<16xf32>
    %12 = vector.shape_cast %11 : vector<16xf32> to vector<1x16xf32>
    %13 = arith.mulf %10, %10 : vector<400x16xf32>
    %cst_3 = arith.constant dense<0.000000e+00> : vector<16xf32>
    %14 = vector.multi_reduction <add>, %13, %cst_3 [0] : vector<400x16xf32> to vector<16xf32>
    %15 = vector.shape_cast %14 : vector<16xf32> to vector<1x16xf32>
    %16 = tpu.concatenate %12, %15 in 0 : vector<1x16xf32>, vector<1x16xf32> -> vector<2x16xf32>
    %17 = vector.shape_cast %16 : vector<2x16xf32> to vector<1x2x16xf32>
    %c0_4 = arith.constant 0 : index
    %c0_5 = arith.constant 0 : index
    %c0_6 = arith.constant 0 : index
    %18 = vector.load %arg2[%c0_4, %c0_5, %c0_6] : memref<1x2x16xf32, #tpu.memory_space<vmem>>, vector<1x2x16xf32>
    tpu.vector_store %arg2[%c0_4, %c0_5, %c0_6], %17 {strides = array<i32>} : memref<1x2x16xf32, #tpu.memory_space<vmem>>, vector<1x2x16xf32>,
    return
  }
  func.func @transform_0(%arg0: i32) -> (i32, i32) {
    %c0_i32 = arith.constant 0 : i32
    %c0_i32_0 = arith.constant 0 : i32
    return %arg0, %c0_i32 : i32, i32
  }
  func.func @transform_1(%arg0: i32) -> (i32, i32, i32) {
    %c0_i32 = arith.constant 0 : i32
    %c0_i32_0 = arith.constant 0 : i32
    %c0_i32_1 = arith.constant 0 : i32
    return %arg0, %c0_i32, %c0_i32_0 : i32, i32, i32
  }
}

module attributes {stable_mosaic.version = 11 : i64} {
  func.func @_bnrelu_matmul_stats_kernel(%arg0: i32, %arg1: memref<400x16xf32, #tpu.memory_space<vmem>>, %arg2: memref<1x16xf32, #tpu.memory_space<vmem>>, %arg3: memref<1x16xf32, #tpu.memory_space<vmem>>, %arg4: memref<16x32xf32, #tpu.memory_space<vmem>>, %arg5: memref<400x32xf32, #tpu.memory_space<vmem>>, %arg6: memref<1x2x32xf32, #tpu.memory_space<vmem>>) attributes {dimension_semantics = [#tpu.dimension_semantics<parallel>], iteration_bounds = array<i64: 1>, scalar_prefetch = 0 : i64, scratch_operands = 0 : i64, tpu.core_type = #tpu.core_type<tc>, window_params = [{transform_indices = @transform_0, window_bounds = array<i64: 400, 16>}, {pipeline_mode = #tpu.pipeline_mode<synchronous>, transform_indices = @transform_1, window_bounds = array<i64: 1, 16>}, {pipeline_mode = #tpu.pipeline_mode<synchronous>, transform_indices = @transform_2, window_bounds = array<i64: 1, 16>}, {pipeline_mode = #tpu.pipeline_mode<synchronous>, transform_indices = @transform_3, window_bounds = array<i64: 16, 32>}, {transform_indices = @transform_4, window_bounds = array<i64: 400, 32>}, {transform_indices = @transform_5, window_bounds = array<i64: 1, 2, 32>}]} {
    %0 = tpu.iota {dimensions = array<i32: 0>} : vector<400x1xi32>
    %c400_i32 = arith.constant 400 : i32
    %1 = arith.muli %arg0, %c400_i32 : i32
    %2 = vector.broadcast %1 : i32 to vector<400x1xi32>
    %3 = arith.addi %0, %2 : vector<400x1xi32>
    %c0 = arith.constant 0 : index
    %c0_0 = arith.constant 0 : index
    %4 = vector.load %arg1[%c0, %c0_0] : memref<400x16xf32, #tpu.memory_space<vmem>>, vector<400x16xf32>
    %c0_1 = arith.constant 0 : index
    %c0_2 = arith.constant 0 : index
    %5 = vector.load %arg2[%c0_1, %c0_2] : memref<1x16xf32, #tpu.memory_space<vmem>>, vector<1x16xf32>
    %6 = vector.broadcast %5 : vector<1x16xf32> to vector<400x16xf32>
    %7 = arith.mulf %4, %6 : vector<400x16xf32>
    %c0_3 = arith.constant 0 : index
    %c0_4 = arith.constant 0 : index
    %8 = vector.load %arg3[%c0_3, %c0_4] : memref<1x16xf32, #tpu.memory_space<vmem>>, vector<1x16xf32>
    %9 = vector.broadcast %8 : vector<1x16xf32> to vector<400x16xf32>
    %10 = arith.addf %7, %9 : vector<400x16xf32>
    %cst = arith.constant 0.000000e+00 : f32
    %11 = vector.broadcast %cst : f32 to vector<400x16xf32>
    %12 = arith.maximumf %10, %11 : vector<400x16xf32>
    %c400_i32_5 = arith.constant 400 : i32
    %13 = vector.broadcast %c400_i32_5 : i32 to vector<400x1xi32>
    %14 = arith.cmpi slt, %3, %13 : vector<400x1xi32>
    %cst_6 = arith.constant 0.000000e+00 : f32
    %15 = vector.shape_cast %14 : vector<400x1xi1> to vector<400x1xi1>
    %16 = vector.broadcast %15 : vector<400x1xi1> to vector<400x16xi1>
    %17 = vector.broadcast %cst_6 : f32 to vector<400x16xf32>
    %18 = arith.select %16, %12, %17 : vector<400x16xi1>, vector<400x16xf32>
    %c0_7 = arith.constant 0 : index
    %c0_8 = arith.constant 0 : index
    %19 = vector.load %arg4[%c0_7, %c0_8] : memref<16x32xf32, #tpu.memory_space<vmem>>, vector<16x32xf32>
    %cst_9 = arith.constant dense<0.000000e+00> : vector<400x32xf32>
    %20 = tpu.matmul %18, %19, %cst_9 {dimension_numbers = #tpu.dot_dimension_numbers<[1], [0], [0], [1], [0, 0, 1, 1], [], []>} : vector<400x16xf32>, vector<16x32xf32>, vector<400x32xf32> -> vector<400x32xf32>
    %c0_10 = arith.constant 0 : index
    %c0_11 = arith.constant 0 : index
    %21 = vector.load %arg5[%c0_10, %c0_11] : memref<400x32xf32, #tpu.memory_space<vmem>>, vector<400x32xf32>
    tpu.vector_store %arg5[%c0_10, %c0_11], %20 {strides = array<i32>} : memref<400x32xf32, #tpu.memory_space<vmem>>, vector<400x32xf32>,
    %cst_12 = arith.constant dense<0.000000e+00> : vector<32xf32>
    %22 = vector.multi_reduction <add>, %20, %cst_12 [0] : vector<400x32xf32> to vector<32xf32>
    %23 = vector.shape_cast %22 : vector<32xf32> to vector<1x32xf32>
    %24 = arith.mulf %20, %20 : vector<400x32xf32>
    %cst_13 = arith.constant dense<0.000000e+00> : vector<32xf32>
    %25 = vector.multi_reduction <add>, %24, %cst_13 [0] : vector<400x32xf32> to vector<32xf32>
    %26 = vector.shape_cast %25 : vector<32xf32> to vector<1x32xf32>
    %27 = tpu.concatenate %23, %26 in 0 : vector<1x32xf32>, vector<1x32xf32> -> vector<2x32xf32>
    %28 = vector.shape_cast %27 : vector<2x32xf32> to vector<1x2x32xf32>
    %c0_14 = arith.constant 0 : index
    %c0_15 = arith.constant 0 : index
    %c0_16 = arith.constant 0 : index
    %29 = vector.load %arg6[%c0_14, %c0_15, %c0_16] : memref<1x2x32xf32, #tpu.memory_space<vmem>>, vector<1x2x32xf32>
    tpu.vector_store %arg6[%c0_14, %c0_15, %c0_16], %28 {strides = array<i32>} : memref<1x2x32xf32, #tpu.memory_space<vmem>>, vector<1x2x32xf32>,
    return
  }
  func.func @transform_0(%arg0: i32) -> (i32, i32) {
    %c0_i32 = arith.constant 0 : i32
    %c0_i32_0 = arith.constant 0 : i32
    return %arg0, %c0_i32 : i32, i32
  }
  func.func @transform_1(%arg0: i32) -> (i32, i32) {
    %c0_i32 = arith.constant 0 : i32
    %c0_i32_0 = arith.constant 0 : i32
    %c0_i32_1 = arith.constant 0 : i32
    return %c0_i32, %c0_i32_0 : i32, i32
  }
  func.func @transform_2(%arg0: i32) -> (i32, i32) {
    %c0_i32 = arith.constant 0 : i32
    %c0_i32_0 = arith.constant 0 : i32
    %c0_i32_1 = arith.constant 0 : i32
    return %c0_i32, %c0_i32_0 : i32, i32
  }
  func.func @transform_3(%arg0: i32) -> (i32, i32) {
    %c0_i32 = arith.constant 0 : i32
    %c0_i32_0 = arith.constant 0 : i32
    %c0_i32_1 = arith.constant 0 : i32
    return %c0_i32, %c0_i32_0 : i32, i32
  }
  func.func @transform_4(%arg0: i32) -> (i32, i32) {
    %c0_i32 = arith.constant 0 : i32
    %c0_i32_0 = arith.constant 0 : i32
    return %arg0, %c0_i32 : i32, i32
  }
  func.func @transform_5(%arg0: i32) -> (i32, i32, i32) {
    %c0_i32 = arith.constant 0 : i32
    %c0_i32_0 = arith.constant 0 : i32
    %c0_i32_1 = arith.constant 0 : i32
    return %arg0, %c0_i32, %c0_i32_0 : i32, i32, i32
  }
}

module attributes {stable_mosaic.version = 11 : i64} {
  func.func @_bnrelu_matmul_tanh_kernel(%arg0: i32, %arg1: memref<400x32xf32, #tpu.memory_space<vmem>>, %arg2: memref<1x32xf32, #tpu.memory_space<vmem>>, %arg3: memref<1x32xf32, #tpu.memory_space<vmem>>, %arg4: memref<32x16xf32, #tpu.memory_space<vmem>>, %arg5: memref<1x16xf32, #tpu.memory_space<vmem>>, %arg6: memref<400x16xf32, #tpu.memory_space<vmem>>) attributes {dimension_semantics = [#tpu.dimension_semantics<parallel>], iteration_bounds = array<i64: 1>, scalar_prefetch = 0 : i64, scratch_operands = 0 : i64, tpu.core_type = #tpu.core_type<tc>, window_params = [{transform_indices = @transform_0, window_bounds = array<i64: 400, 32>}, {pipeline_mode = #tpu.pipeline_mode<synchronous>, transform_indices = @transform_1, window_bounds = array<i64: 1, 32>}, {pipeline_mode = #tpu.pipeline_mode<synchronous>, transform_indices = @transform_2, window_bounds = array<i64: 1, 32>}, {pipeline_mode = #tpu.pipeline_mode<synchronous>, transform_indices = @transform_3, window_bounds = array<i64: 32, 16>}, {pipeline_mode = #tpu.pipeline_mode<synchronous>, transform_indices = @transform_4, window_bounds = array<i64: 1, 16>}, {transform_indices = @transform_5, window_bounds = array<i64: 400, 16>}]} {
    %c0 = arith.constant 0 : index
    %c0_0 = arith.constant 0 : index
    %0 = vector.load %arg1[%c0, %c0_0] : memref<400x32xf32, #tpu.memory_space<vmem>>, vector<400x32xf32>
    %c0_1 = arith.constant 0 : index
    %c0_2 = arith.constant 0 : index
    %1 = vector.load %arg2[%c0_1, %c0_2] : memref<1x32xf32, #tpu.memory_space<vmem>>, vector<1x32xf32>
    %2 = vector.broadcast %1 : vector<1x32xf32> to vector<400x32xf32>
    %3 = arith.mulf %0, %2 : vector<400x32xf32>
    %c0_3 = arith.constant 0 : index
    %c0_4 = arith.constant 0 : index
    %4 = vector.load %arg3[%c0_3, %c0_4] : memref<1x32xf32, #tpu.memory_space<vmem>>, vector<1x32xf32>
    %5 = vector.broadcast %4 : vector<1x32xf32> to vector<400x32xf32>
    %6 = arith.addf %3, %5 : vector<400x32xf32>
    %cst = arith.constant 0.000000e+00 : f32
    %7 = vector.broadcast %cst : f32 to vector<400x32xf32>
    %8 = arith.maximumf %6, %7 : vector<400x32xf32>
    %c0_5 = arith.constant 0 : index
    %c0_6 = arith.constant 0 : index
    %9 = vector.load %arg4[%c0_5, %c0_6] : memref<32x16xf32, #tpu.memory_space<vmem>>, vector<32x16xf32>
    %cst_7 = arith.constant dense<0.000000e+00> : vector<400x16xf32>
    %10 = tpu.matmul %8, %9, %cst_7 {dimension_numbers = #tpu.dot_dimension_numbers<[1], [0], [0], [1], [0, 0, 1, 1], [], []>} : vector<400x32xf32>, vector<32x16xf32>, vector<400x16xf32> -> vector<400x16xf32>
    %c0_8 = arith.constant 0 : index
    %c0_9 = arith.constant 0 : index
    %11 = vector.load %arg5[%c0_8, %c0_9] : memref<1x16xf32, #tpu.memory_space<vmem>>, vector<1x16xf32>
    %12 = vector.broadcast %11 : vector<1x16xf32> to vector<400x16xf32>
    %13 = arith.addf %10, %12 : vector<400x16xf32>
    %14 = math.tanh %13 : vector<400x16xf32>
    %c0_10 = arith.constant 0 : index
    %c0_11 = arith.constant 0 : index
    %15 = vector.load %arg6[%c0_10, %c0_11] : memref<400x16xf32, #tpu.memory_space<vmem>>, vector<400x16xf32>
    tpu.vector_store %arg6[%c0_10, %c0_11], %14 {strides = array<i32>} : memref<400x16xf32, #tpu.memory_space<vmem>>, vector<400x16xf32>,
    return
  }
  func.func @transform_0(%arg0: i32) -> (i32, i32) {
    %c0_i32 = arith.constant 0 : i32
    %c0_i32_0 = arith.constant 0 : i32
    return %arg0, %c0_i32 : i32, i32
  }
  func.func @transform_1(%arg0: i32) -> (i32, i32) {
    %c0_i32 = arith.constant 0 : i32
    %c0_i32_0 = arith.constant 0 : i32
    %c0_i32_1 = arith.constant 0 : i32
    return %c0_i32, %c0_i32_0 : i32, i32
  }
  func.func @transform_2(%arg0: i32) -> (i32, i32) {
    %c0_i32 = arith.constant 0 : i32
    %c0_i32_0 = arith.constant 0 : i32
    %c0_i32_1 = arith.constant 0 : i32
    return %c0_i32, %c0_i32_0 : i32, i32
  }
  func.func @transform_3(%arg0: i32) -> (i32, i32) {
    %c0_i32 = arith.constant 0 : i32
    %c0_i32_0 = arith.constant 0 : i32
    %c0_i32_1 = arith.constant 0 : i32
    return %c0_i32, %c0_i32_0 : i32, i32
  }
  func.func @transform_4(%arg0: i32) -> (i32, i32) {
    %c0_i32 = arith.constant 0 : i32
    %c0_i32_0 = arith.constant 0 : i32
    %c0_i32_1 = arith.constant 0 : i32
    return %c0_i32, %c0_i32_0 : i32, i32
  }
  func.func @transform_5(%arg0: i32) -> (i32, i32) {
    %c0_i32 = arith.constant 0 : i32
    %c0_i32_0 = arith.constant 0 : i32
    return %arg0, %c0_i32 : i32, i32
  }
}

</mosaic_0001>

<bundles_post_ra>
// kernel: generator_forward.6
= control target key start
LH: loop header
LB: loop body
LE: loop exit
PB: predicated region body
PF: predicated region fallthrough
CT: control target
= control target key end

     0   :  { %7 = vsyncpa [#allocation3], 0  ;;  %s243_s9 = smov [#allocation2]   ;;  %s353_s0 = inlined_call_operand.vmem [shape: f32[64,32], index: 0, kind: input, shape index: {}]   ;;  %s354_s1 = inlined_call_operand.hbm [shape: f32[32,144], index: 1, kind: input, shape index: {}]   ;;  %s355_s2 = inlined_call_operand.vmem [shape: f32[64,144], index: 2, kind: output, shape index: {}]  }
   0x1   :  { %s15_s10 = sshll.u32 %s243_s9, 4  ;;  %s16_s10 = int_to_ptr.vmem [resolvable:$true] %s15_s10 }
   0x2   :  { %s229_s11 = scalar_lea.vmem %s16_s10, 1024  ;;  %p234_p1 = scmp.lt.s32.totalorder %s16_s10, %s16_s10 }
   0x3   :  { %p230_p0 = scmp.ne.s32.totalorder %s16_s10, %s229_s11  ;;  %p235_p2 = scmp.lt.s32.totalorder %s229_s11, %s229_s11 }
   0x5   :  { %p236_p3 = por %p235_p2, %p234_p1 }
   0x7   :  { %p237_p4 = pnand %p236_p3, %p230_p0 }
   0x9   :  { %240 = shalt.err (!%p237_p4)
}
   0xa   :  { %s244_s12 = smov 256   ;;  %s245_s13 = smov 16  }
   0xb   :  { %21 = dma.hbm_to_vmem [thread:$0]  %s354_s1, 1024, %s16_s10, [#allocation3], %s244_s12, %s244_s12, %s245_s13  }
   0xc   :  { %241 = dma.done.wait [#allocation3], 1024  }
   0xd   :  { %242 = vsyncadd [#allocation3], 4294966272  ;;  %v246_v0 = vmov 0.0   ;;  %v40_v1 = vld [vmem:[#allocation2 + $0x38] sm:$0xff]  ;;  %v39_v2 = vld [vmem:[#allocation2 + $0x30] sm:$0xff]  ;;  %vm41_vm0 = vcmask 261120  }
   0xe   :  { %130 = vmatprep.mubr.f32.mxu0 %v246_v0  ;;  %154 = vmatprep.mubr.f32.mxu1 %v246_v0  ;;  %v38_v3 = vld [vmem:[#allocation2 + $0x28] sm:$0xff]  ;;  %v37_v4 = vld [vmem:[#allocation2 + $0x20] sm:$0xff]  ;;  %v36_v5 = vld [vmem:[#allocation2 + $0x18] sm:$0xff]  ;;  %vm180_vm1 = vcmask 130048  }
   0xf   :  { %90 = vmatprep.subr.mxu0 %v40_v1  ;;  %209 = vmatprep.subr.mxu1 %v40_v1  ;;  %v35_v6 = vld [vmem:[#allocation2 + $0x10] sm:$0xff]  ;;  %v34_v7 = vld [vmem:[#allocation2 + $0x8] sm:$0xff]  ;;  %v33_v8 = vld [vmem:[#allocation2] sm:$0xff] }
  0x10   :  { %91 = vmatpush1.msra.mxu0 %v39_v2  ;;  %213 = vmatpush1.msra.mxu1 %v39_v2  ;;  %v25_v9 = vld [vmem:[%s353_s0] sm:$0xff]  ;;  %v26_v11 = vld [vmem:[%s353_s0 + $0x8] sm:$0xff]  ;;  %v27_v13 = vld [vmem:[%s353_s0 + $0x10] sm:$0xff] }
  0x11   :  { %92 = vmatprep.subr.mxu0 %v38_v3  ;;  %210 = vmatprep.subr.mxu1 %v38_v3  ;;  %v29_v10 = vld [vmem:[%s353_s0 + $0x20] sm:$0xff]  ;;  %v30_v12 = vld [vmem:[%s353_s0 + $0x28] sm:$0xff]  ;;  %v31_v14 = vld [vmem:[%s353_s0 + $0x30] sm:$0xff] }
  0x12   :  { %93 = vmatpush1.msra.mxu0 %v37_v4  ;;  %214 = vmatpush1.msra.mxu1 %v37_v4  ;;  %v28_v15 = vld [vmem:[%s353_s0 + $0x18] sm:$0xff] }
  0x13   :  { %94 = vmatprep.subr.mxu0 %v36_v5  ;;  %211 = vmatprep.subr.mxu1 %v36_v5  ;;  %v32_v16 = vld [vmem:[%s353_s0 + $0x38] sm:$0xff] }
  0x14   :  { %95 = vmatpush1.msra.mxu0 %v35_v6  ;;  %215 = vmatpush1.msra.mxu1 %v35_v6 }
  0x15   :  { %96 = vmatprep.subr.mxu0 %v34_v7  ;;  %212 = vmatprep.subr.mxu1 %v34_v7 }
  0x16   :  { %97 = vmatpush1.msra.mxu0 %v33_v8  ;;  %216 = vmatpush1.msra.mxu1 %v33_v8 }
  0x17   :  { %201 = vmatmul.mubr.msk.f32.vlgmr.msra.gmra.mxu0 %vm41_vm0, %v25_v9  ;;  %205 = vmatmul.mubr.msk.f32.vlgmr.msra.gmra.mxu1 %vm41_vm0, %v29_v10 }
  0x18   :  { %136 = vmatprep.mubr.f32.mxu0 %v246_v0  ;;  %160 = vmatprep.mubr.f32.mxu1 %v246_v0 }
  0x1b   :  { %202 = vmatmul.mubr.msk.f32.gmra.mxu0 %vm41_vm0, %v26_v11  ;;  %206 = vmatmul.mubr.msk.f32.gmra.mxu1 %vm41_vm0, %v30_v12 }
  0x1c   :  { %142 = vmatprep.mubr.f32.mxu0 %v246_v0  ;;  %166 = vmatprep.mubr.f32.mxu1 %v246_v0 }
  0x1f   :  { %203 = vmatmul.mubr.msk.f32.gmra.mxu0 %vm41_vm0, %v27_v13  ;;  %207 = vmatmul.mubr.msk.f32.gmra.mxu1 %vm41_vm0, %v31_v14 }
  0x20   :  { %148 = vmatprep.mubr.f32.mxu0 %v246_v0  ;;  %172 = vmatprep.mubr.f32.mxu1 %v246_v0 }
  0x23   :  { %204 = vmatmul.mubr.msk.f32.gmra.mxu0 %vm41_vm0, %v28_v15  ;;  %208 = vmatmul.mubr.msk.f32.gmra.mxu1 %vm41_vm0, %v32_v16 }
  0xd7   :  { %v132_v17 = vpop.f32.mrf.mxu0  ;;  %v156_v18 = vpop.f32.mrf.mxu1 }
  0xd8   :  { %179 = vst [vmem:[%s355_s2] sm:$0xff] %v132_v17  ;;  %188 = vst [vmem:[%s355_s2 + $0x40] sm:$0xff] %v156_v18 }
  0xd9   :  { %v134_v19 = vpop.f32.mrf.mxu0  ;;  %v158_v20 = vpop.f32.mrf.mxu1 }
  0xda   :  { %181 = vst.msk [vmem:[%s355_s2 + $0x8] sm:$0xff] %vm180_vm1, %v134_v19  ;;  %189 = vst.msk [vmem:[%s355_s2 + $0x48] sm:$0xff] %vm180_vm1, %v158_v20 }
  0xdb   :  { %v138_v21 = vpop.f32.mrf.mxu0  ;;  %v162_v22 = vpop.f32.mrf.mxu1 }
  0xdc   :  { %182 = vst [vmem:[%s355_s2 + $0x10] sm:$0xff] %v138_v21  ;;  %190 = vst [vmem:[%s355_s2 + $0x50] sm:$0xff] %v162_v22 }
  0xdd   :  { %v140_v23 = vpop.f32.mrf.mxu0  ;;  %v164_v24 = vpop.f32.mrf.mxu1 }
  0xde   :  { %183 = vst.msk [vmem:[%s355_s2 + $0x18] sm:$0xff] %vm180_vm1, %v140_v23  ;;  %191 = vst.msk [vmem:[%s355_s2 + $0x58] sm:$0xff] %vm180_vm1, %v164_v24 }
  0xdf   :  { %v144_v25 = vpop.f32.mrf.mxu0  ;;  %v168_v26 = vpop.f32.mrf.mxu1 }
  0xe0   :  { %184 = vst [vmem:[%s355_s2 + $0x20] sm:$0xff] %v144_v25  ;;  %192 = vst [vmem:[%s355_s2 + $0x60] sm:$0xff] %v168_v26 }
  0xe1   :  { %v146_v27 = vpop.f32.mrf.mxu0  ;;  %v170_v28 = vpop.f32.mrf.mxu1 }
  0xe2   :  { %185 = vst.msk [vmem:[%s355_s2 + $0x28] sm:$0xff] %vm180_vm1, %v146_v27  ;;  %193 = vst.msk [vmem:[%s355_s2 + $0x68] sm:$0xff] %vm180_vm1, %v170_v28 }
  0xe3   :  { %v150_v29 = vpop.f32.mrf.mxu0  ;;  %v174_v30 = vpop.f32.mrf.mxu1 }
  0xe4   :  { %186 = vst [vmem:[%s355_s2 + $0x30] sm:$0xff] %v150_v29  ;;  %194 = vst [vmem:[%s355_s2 + $0x70] sm:$0xff] %v174_v30 }
  0xe5   :  { %v152_v31 = vpop.f32.mrf.mxu0  ;;  %v176_v32 = vpop.f32.mrf.mxu1 }
  0xe6   :  { %187 = vst.msk [vmem:[%s355_s2 + $0x38] sm:$0xff] %vm180_vm1, %v152_v31  ;;  %195 = vst.msk [vmem:[%s355_s2 + $0x78] sm:$0xff] %vm180_vm1, %v176_v32 }
  0xe7   :  { %200 = vsyncpa [#allocation3], 1 }

// kernel: generator_forward.5
= control target key start
LH: loop header
LB: loop body
LE: loop exit
PB: predicated region body
PF: predicated region fallthrough
CT: control target
= control target key end

     0   :  { %8 = vsyncpa [#allocation3], 0  ;;  %s289_s0 = inlined_call_operand.hbm [shape: f32[16,32], index: 0, kind: input, shape index: {}]   ;;  %s290_s1 = inlined_call_operand.hbm [shape: f32[32,128], index: 1, kind: input, shape index: {}]   ;;  %s291_s2 = inlined_call_operand.hbm [shape: f32[1,128], index: 2, kind: input, shape index: {}]   ;;  %s292_s3 = inlined_call_operand.vmem [shape: f32[16,128], index: 3, kind: output, shape index: {}]  }
   0x1   :  { %9 = vsyncpa [#allocation5], 0  ;;  %s247_s12 = smov [#allocation4]   ;;  %s248_s14 = smov [#allocation2]  }
   0x2   :  { %s27_s13 = sshll.u32 %s247_s12, 4  ;;  %s15_s15 = sshll.u32 %s248_s14, 4  ;;  %s28_s13 = int_to_ptr.vmem [resolvable:$true] %s27_s13  ;;  %s16_s15 = int_to_ptr.vmem [resolvable:$true] %s15_s15 }
   0x3   :  { %s191_s16 = scalar_lea.vmem %s28_s13, 512  ;;  %p196_p1 = scmp.lt.s32.totalorder %s28_s13, %s28_s13 }
   0x4   :  { %p192_p0 = scmp.ne.s32.totalorder %s28_s13, %s191_s16  ;;  %p197_p2 = scmp.lt.s32.totalorder %s191_s16, %s191_s16 }
   0x6   :  { %p198_p3 = por %p197_p2, %p196_p1 }
   0x8   :  { %p199_p4 = pnand %p198_p3, %p192_p0 }
   0xa   :  { %202 = shalt.err (!%p199_p4)
}
   0xb   :  { %s249_s17 = smov 128   ;;  %s250_s18 = smov 8  }
   0xc   :  { %33 = dma.hbm_to_vmem [thread:$0]  %s290_s1, 512, %s28_s13, [#allocation5], %s249_s17, %s249_s17, %s250_s18  }
   0xd   :  { %s211_s21 = scalar_lea.vmem %s16_s15, 256  ;;  %p216_p6 = scmp.lt.s32.totalorder %s16_s15, %s16_s15 }
   0xe   :  { %p212_p5 = scmp.ne.s32.totalorder %s16_s15, %s211_s21  ;;  %p217_p7 = scmp.lt.s32.totalorder %s211_s21, %s211_s21 }
  0x10   :  { %p218_p8 = por %p217_p7, %p216_p6 }
  0x12   :  { %p219_p9 = pnand %p218_p8, %p212_p5 }
  0x14   :  { %222 = shalt.err (!%p219_p9)
}
  0x15   :  { %21 = dma.hbm_to_vmem [thread:$0]  %s289_s0, 256, %s16_s15, [#allocation3], %s249_s17, %s249_s17, %s250_s18  }
  0x16   :  { %s251_s24 = smov [#allocation6]  }
  0x17   :  { %s40_s25 = sshll.u32 %s251_s24, 4  ;;  %s41_s25 = int_to_ptr.vmem [resolvable:$true] %s40_s25 }
  0x18   :  { %s231_s26 = scalar_lea.vmem %s41_s25, 16  ;;  %s235_s27 = scalar_lea.vmem %s41_s25, 32 }
  0x19   :  { %p232_p10 = scmp.ne.s32.totalorder %s41_s25, %s231_s26  ;;  %p236_p11 = scmp.lt.s32.totalorder %s41_s25, %s41_s25 }
  0x1a   :  { %p237_p12 = scmp.lt.s32.totalorder %s235_s27, %s231_s26 }
  0x1c   :  { %p238_p13 = por %p237_p12, %p236_p11 }
  0x1e   :  { %p239_p0 = pnand %p238_p13, %p232_p10 }
  0x20   :  { %242 = shalt.err (!%p239_p0)
}
  0x21   :  { %43 = dma.hbm_to_vmem [thread:$0]  %s291_s2, 16, %s41_s25, [#allocation5]  }
  0x22   :  { %243 = dma.done.wait [#allocation3], 256  }
  0x23   :  { %244 = vsyncadd [#allocation3], 4294967040 }
  0x24   :  { %245 = dma.done.wait [#allocation5], 528  }
  0x25   :  { %246 = vsyncadd [#allocation5], 4294966768  ;;  %vm66_vm0 = vcmask 261120   ;;  %v58_v0 = vld [vmem:[#allocation4 + $0x18] sm:$0xff]  ;;  %v57_v1 = vld [vmem:[#allocation4 + $0x10] sm:$0xff] }
  0x26   :  { %167 = vmatprep.subr.mxu0 %v58_v0  ;;  %v53_v2 = vld [vmem:[#allocation2] sm:$0xff]  ;;  %v56_v3 = vld [vmem:[#allocation4 + $0x8] sm:$0xff]  ;;  %v55_v4 = vld [vmem:[#allocation4] sm:$0xff] }
  0x27   :  { %168 = vmatpush3.msra.mxu0 %v58_v0  ;;  %175 = vmatprep.mubr.msk.f32.mxu0 %vm66_vm0, %v53_v2  ;;  %v54_v5 = vld [vmem:[#allocation2 + $0x8] sm:$0xff]  ;;  %v158_v6 = vld [vmem:[#allocation6] ss:$0 sm:$0xff] }
  0x28   :  { %169 = vmatprep.subr.mxu0 %v57_v1 }
  0x29   :  { %170 = vmatpush3.msra.mxu0 %v57_v1 }
  0x2a   :  { %171 = vmatprep.subr.mxu0 %v56_v3 }
  0x2b   :  { %172 = vmatpush3.msra.mxu0 %v56_v3 }
  0x2c   :  { %173 = vmatprep.subr.mxu0 %v55_v4 }
  0x2d   :  { %174 = vmatpush3.msra.mxu0 %v55_v4 }
  0x2e   :  { %176 = vmatmul.mubr.msk.f32.vlgmr.msra.gmra.mxu0 %vm66_vm0, %v54_v5 }
  0xee   :  { %v177_v7 = vpop.f32.mrf.mxu0 }
  0xef   :  { %v145_v8 = vadd.f32 %v177_v7, %v158_v6 }
  0xf0   :  { %v139_v9 = vpop.f32.mrf.mxu0 }
  0xf1   :  { %v149_v10 = vmax.f32 %v145_v8, 0.0  ;;  %v140_v11 = vadd.f32 %v158_v6, %v139_v9 }
  0xf3   :  { %151 = vst [vmem:[%s292_s3 + $0x8] sm:$0xff] %v149_v10  ;;  %v148_v12 = vmax.f32 %v140_v11, 0.0 }
  0xf5   :  { %150 = vst [vmem:[%s292_s3] sm:$0xff] %v148_v12 }
  0xf6   :  { %156 = vsyncpa [#allocation3], 1 }
  0xf7   :  { %157 = vsyncpa [#allocation5], 1 }

// kernel: tile.17
= control target key start
LH: loop header
LB: loop body
LE: loop exit
PB: predicated region body
PF: predicated region fallthrough
CT: control target
= control target key end

     0   :  { %s22_s0 = inlined_call_operand.vmem [shape: f32[8], index: 0, kind: input, shape index: {}]   ;;  %s23_s1 = inlined_call_operand.vmem [shape: f32[4,8], index: 1, kind: output, shape index: {}]  }
   0x1   :  { %v4_v0 = vld [vmem:[%s22_s0] ss:$0 sm:$0xff] }
   0x2   :  { %5 = vst [vmem:[%s23_s1] sm:$0xf] %v4_v0 }

// kernel: tile.19
= control target key start
LH: loop header
LB: loop body
LE: loop exit
PB: predicated region body
PF: predicated region fallthrough
CT: control target
= control target key end

     0   :  { %vm8_vm0 = vcmask 64512   ;;  %s40_s8 = smov 8   ;;  %s41_s9 = smov 16   ;;  %vm14_vm1 = vcmask 261312   ;;  %vm20_vm2 = vcmask 195712   ;;  %vm26_vm3 = vcmask 130112   ;;  %s58_s0 = inlined_call_operand.vmem [shape: f32[4,8], index: 0, kind: input, shape index: {}]   ;;  %s59_s1 = inlined_call_operand.vmem [shape: f32[1,32], index: 1, kind: output, shape index: {}]  }
   0x1   :  { %v5_v0 = vld [vmem:[%s58_s0] sm:$0xf]  ;;  %s39_s0 = smov 24  }
   0x2   :  { %6 = vst [vmem:[#allocation1] sm:$0xf] %v5_v0 }
   0x9   :  { %v11_v1 = vld [vmem:[#allocation1 + $0x3] sm:$0x1]   ;;  %v23_v2 = vld [vmem:[#allocation1 + $0x1] sm:$0x1]   ;;  %v7_v3 = vld [vmem:[#allocation1] sm:$0x1]  }
   0xa   :  { %12 = vrot.lane.b32.xlu0 %v11_v1, %s39_s0  ;;  %24 = vrot.lane.b32.xlu1 %v23_v2, %s40_s8  ;;  %v17_v4 = vld [vmem:[#allocation1 + $0x2] sm:$0x1]   ;;  %9 = vst.msk [vmem:[#allocation0] sm:$0x1] %vm8_vm0, %v7_v3  }
   0xe   :  { %18 = vrot.lane.b32.xlu0 %v17_v4, %s41_s9 }
  0x7c   :  { %v13_v5 = vpop.permute.xlu0 %12   ;;  %v25_v6 = vpop.permute.xlu1 %24  }
  0x7d   :  { %15 = vst.msk [vmem:[#allocation0] sm:$0x1] %vm14_vm1, %v13_v5  }
  0x80   :  { %v19_v7 = vpop.permute.xlu0 %18  }
  0x81   :  { %21 = vst.msk [vmem:[#allocation0] sm:$0x1] %vm20_vm2, %v19_v7  }
  0x82   :  { %27 = vst.msk [vmem:[#allocation0] sm:$0x1] %vm26_vm3, %v25_v6  }
  0x89   :  { %v32_v8 = vld [vmem:[#allocation0] sm:$0x1] }
  0x8a   :  { %35 = vst [vmem:[%s59_s1] sm:$0x1] %v32_v8 }

// kernel: generator_forward.7
= control target key start
LH: loop header
LB: loop body
LE: loop exit
PB: predicated region body
PF: predicated region fallthrough
CT: control target
= control target key end

     0   :  { %vm361_vm0 = vcmask 130048   ;;  %vm622_vm1 = vcmask 1040384   ;;  %vm624_vm2 = vcmask 123904   ;;  %s1215_s0 = inlined_call_operand.vmem [shape: f32[400,16], index: 0, kind: input, shape index: {}]   ;;  %s1216_s1 = inlined_call_operand.vmem [shape: f32[1,2,16], index: 1, kind: output, shape index: {}]  }
   0x1   :  { %v643_v0 = vld [vmem:[%s1215_s0] sm:$0xff]  ;;  %v648_v1 = vld [vmem:[%s1215_s0 + $0x8] sm:$0xff]  ;;  %v653_v2 = vld [vmem:[%s1215_s0 + $0x10] sm:$0xff] }
   0x2   :  { %v362_v3 = vsel %vm361_vm0, %v643_v0, 0.0  ;;  %v363_v4 = vsel %vm361_vm0, %v648_v1, 0.0  ;;  %v365_v5 = vsel %vm361_vm0, %v653_v2, 0.0  ;;  %v664_v6 = vld [vmem:[%s1215_s0 + $0x18] sm:$0xff]  ;;  %v671_v9 = vld [vmem:[%s1215_s0 + $0x20] sm:$0xff]  ;;  %v678_v12 = vld [vmem:[%s1215_s0 + $0x28] sm:$0xff] }
   0x3   :  { %v364_v7 = vadd.f32 %v363_v4, %v362_v3  ;;  %v367_v8 = vsel %vm361_vm0, %v664_v6, 0.0  ;;  %v369_v11 = vsel %vm361_vm0, %v671_v9, 0.0  ;;  %v371_v14 = vsel %vm361_vm0, %v678_v12, 0.0  ;;  %v685_v15 = vld [vmem:[%s1215_s0 + $0x30] sm:$0xff]  ;;  %v692_v18 = vld [vmem:[%s1215_s0 + $0x38] sm:$0xff]  ;;  %v697_v19 = vld [vmem:[%s1215_s0 + $0x40] sm:$0xff] }
   0x4   :  { %v373_v17 = vsel %vm361_vm0, %v685_v15, 0.0  ;;  %v702_v20 = vld [vmem:[%s1215_s0 + $0x48] sm:$0xff]  ;;  %v712_v23 = vld [vmem:[%s1215_s0 + $0x110] sm:$0xff]  ;;  %v717_v24 = vld [vmem:[%s1215_s0 + $0x118] sm:$0xff]  ;;  %v375_v25 = vsel %vm361_vm0, %v692_v18, 0.0  ;;  %v377_v26 = vsel %vm361_vm0, %v697_v19, 0.0 }
   0x5   :  { %v366_v10 = vadd.f32 %v365_v5, %v364_v7  ;;  %v707_v22 = vld [vmem:[%s1215_s0 + $0x108] sm:$0xff]  ;;  %v379_v27 = vsel %vm361_vm0, %v702_v20, 0.0  ;;  %v728_v28 = vld [vmem:[%s1215_s0 + $0x120] sm:$0xff]  ;;  %v738_v30 = vld [vmem:[%s1215_s0 + $0x130] sm:$0xff]  ;;  %v746_v33 = vsel %vm361_vm0, %v712_v23, 0.0  ;;  %v750_v34 = vsel %vm361_vm0, %v717_v24, 0.0 }
   0x6   :  { %v733_v29 = vld [vmem:[%s1215_s0 + $0x128] sm:$0xff]  ;;  %v742_v32 = vsel %vm361_vm0, %v707_v22, 0.0  ;;  %1219 = vst [vmem:[#allocation2_spill] sm:$0xff] %v746_v33  ;;  %1220 = vst [vmem:[#allocation3_spill] sm:$0xff] %v750_v34  ;;  %v755_v35 = vld [vmem:[%s1215_s0 + $0x138] sm:$0xff]  ;;  %v769_v38 = vsel %vm361_vm0, %v728_v28, 0.0 }
   0x7   :  { %v368_v13 = vadd.f32 %v367_v8, %v366_v10  ;;  %v760_v36 = vld [vmem:[%s1215_s0 + $0x140] sm:$0xff]  ;;  %v765_v37 = vld [vmem:[%s1215_s0 + $0x148] sm:$0xff]  ;;  %1221 = vst [vmem:[#allocation4_spill] sm:$0xff] %v769_v38  ;;  %v773_v39 = vsel %vm361_vm0, %v733_v29, 0.0  ;;  %v777_v40 = vsel %vm361_vm0, %v738_v30, 0.0  ;;  %v782_v41 = vld [vmem:[%s1215_s0 + $0x150] sm:$0xff] }
   0x8   :  { %1222 = vst [vmem:[#allocation5_spill] sm:$0xff] %v773_v39  ;;  %1223 = vst [vmem:[#allocation6_spill] sm:$0xff] %v777_v40  ;;  %v787_v42 = vld [vmem:[%s1215_s0 + $0x158] sm:$0xff]  ;;  %v792_v43 = vld [vmem:[%s1215_s0 + $0x160] sm:$0xff]  ;;  %v796_v45 = vsel %vm361_vm0, %v755_v35, 0.0  ;;  %v800_v46 = vsel %vm361_vm0, %v760_v36, 0.0  ;;  %v473_v40 = vmul.f32 %v685_v15, %v685_v15  ;;  %v474_v39 = vmul.f32 %v692_v18, %v692_v18 }
   0x9   :  { %v370_v16 = vadd.f32 %v369_v11, %v368_v13  ;;  %1224 = vst [vmem:[#allocation7_spill] sm:$0xff] %v796_v45  ;;  %1225 = vst [vmem:[#allocation8_spill] sm:$0xff] %v800_v46  ;;  %v804_v47 = vsel %vm361_vm0, %v765_v37, 0.0  ;;  %v809_v48 = vld [vmem:[%s1215_s0 + $0x168] sm:$0xff]  ;;  %v814_v49 = vld [vmem:[%s1215_s0 + $0x170] sm:$0xff]  ;;  %v823_v51 = vsel %vm361_vm0, %v782_v41, 0.0  ;;  %v471_v46 = vmul.f32 %v671_v9, %v671_v9 }
   0xa   :  { %1226 = vst [vmem:[#allocation9_spill] sm:$0xff] %v804_v47  ;;  %v819_v50 = vld [vmem:[%s1215_s0 + $0x178] sm:$0xff]  ;;  %1227 = vst [vmem:[#allocation10_spill] sm:$0xff] %v823_v51  ;;  %v827_v52 = vsel %vm361_vm0, %v787_v42, 0.0  ;;  %v831_v53 = vsel %vm361_vm0, %v792_v43, 0.0  ;;  %v171_v54 = vld [vmem:[%s1215_s0 + $0x50] sm:$0xff]  ;;  %v472_v45 = vmul.f32 %v678_v12, %v678_v12  ;;  %v476_v12 = vmul.f32 %v702_v20, %v702_v20 }
   0xb   :  { %v372_v21 = vadd.f32 %v371_v14, %v370_v16  ;;  %1228 = vst [vmem:[#allocation11_spill] sm:$0xff] %v827_v52  ;;  %1229 = vst [vmem:[#allocation12_spill] sm:$0xff] %v831_v53  ;;  %v839_v55 = vld [vmem:[%s1215_s0 + $0x180] sm:$0xff]  ;;  %v844_v56 = vld [vmem:[%s1215_s0 + $0x188] sm:$0xff]  ;;  %v848_v58 = vsel %vm361_vm0, %v809_v48, 0.0  ;;  %v852_v59 = vsel %vm361_vm0, %v814_v49, 0.0  ;;  %v470_v52 = vmul.f32 %v664_v6, %v664_v6 }
   0xc   :  { %1230 = vst [vmem:[#allocation13_spill] sm:$0xff] %v848_v58  ;;  %1231 = vst [vmem:[#allocation14_spill] sm:$0xff] %v852_v59  ;;  %v856_v60 = vsel %vm361_vm0, %v819_v50, 0.0  ;;  %v381_v61 = vsel %vm361_vm0, %v171_v54, 0.0  ;;  %v861_v62 = vsel %vm361_vm0, %v839_v55, 0.0  ;;  %v865_v63 = vsel %vm361_vm0, %v844_v56, 0.0 }
   0xd   :  { %v374_v31 = vadd.f32 %v373_v17, %v372_v21  ;;  %1232 = vst [vmem:[#allocation15_spill] sm:$0xff] %v856_v60  ;;  %1233 = vst [vmem:[#allocation16_spill] sm:$0xff] %v861_v62  ;;  %v172_v3 = vld [vmem:[%s1215_s0 + $0x58] sm:$0xff]  ;;  %v173_v7 = vld [vmem:[%s1215_s0 + $0x60] sm:$0xff]  ;;  %v522_v15 = vsel %vm361_vm0, %v470_v52, 0.0  ;;  %v503_v20 = vmul.f32 %v728_v28, %v728_v28  ;;  %v504_v52 = vmul.f32 %v733_v29, %v733_v29 }
   0xe   :  { %1234 = vst [vmem:[#allocation17_spill] sm:$0xff] %v865_v63  ;;  %v383_v5 = vsel %vm361_vm0, %v172_v3, 0.0  ;;  %v385_v10 = vsel %vm361_vm0, %v173_v7, 0.0  ;;  %v878_v11 = vld [vmem:[%s1215_s0 + $0x68] sm:$0xff]  ;;  %v883_v14 = vld [vmem:[%s1215_s0 + $0x70] sm:$0xff]  ;;  %v890_v17 = vld [vmem:[%s1215_s0 + $0x78] sm:$0xff]  ;;  %v988_v33 = vmul.f32 %v172_v3, %v172_v3  ;;  %v510_v29 = vmul.f32 %v787_v42, %v787_v42 }
   0xf   :  { %v376_v44 = vadd.f32 %v375_v25, %v374_v31  ;;  %v387_v16 = vsel %vm361_vm0, %v878_v11, 0.0  ;;  %v895_v21 = vld [vmem:[%s1215_s0 + $0x80] sm:$0xff]  ;;  %v900_v25 = vld [vmem:[%s1215_s0 + $0x88] sm:$0xff]  ;;  %v467_v31 = vmul.f32 %v643_v0, %v643_v0  ;;  %v391_v0 = vsel %vm361_vm0, %v890_v17, 0.0  ;;  %v944_v63 = vld [vmem:[%s1215_s0 + $0xb8] sm:$0xff] }
  0x10   :  { %1235 = vst [vmem:[#allocation18_spill] sm:$0xff] %v944_v63  ;;  %v955_v58 = vld [vmem:[%s1215_s0 + $0xc0] sm:$0xff]  ;;  %v526_v28 = vsel %vm361_vm0, %v472_v45, 0.0 }
  0x11   :  { %v378_v57 = vadd.f32 %v377_v26, %v376_v44  ;;  %v468_v44 = vmul.f32 %v648_v1, %v648_v1  ;;  %v393_v1 = vsel %vm361_vm0, %v895_v21, 0.0  ;;  %1236 = vst [vmem:[#allocation19_spill] sm:$0xff] %v955_v58  ;;  %v971_v47 = vsel %vm361_vm0, %v955_v58, 0.0 }
  0x12   :  { %v517_v38 = vsel %vm361_vm0, %v467_v31, 0.0  ;;  %v477_v58 = vmul.f32 %v171_v54, %v171_v54  ;;  %v524_v54 = vsel %vm361_vm0, %v471_v46, 0.0 }
  0x13   :  { %v380_v4 = vadd.f32 %v379_v27, %v378_v57  ;;  %v389_v27 = vsel %vm361_vm0, %v883_v14, 0.0  ;;  %v911_v57 = vld [vmem:[%s1215_s0 + $0x90] sm:$0xff]  ;;  %v518_v6 = vsel %vm361_vm0, %v468_v44, 0.0  ;;  %v509_v44 = vmul.f32 %v782_v41, %v782_v41 }
  0x14   :  { %v397_v60 = vsel %vm361_vm0, %v911_v57, 0.0  ;;  %v519_v34 = vadd.f32 %v518_v6, %v517_v38  ;;  %v502_v38 = vmul.f32 %v717_v24, %v717_v24  ;;  %v508_v24 = vmul.f32 %v765_v37, %v765_v37 }
  0x15   :  { %v382_v8 = vadd.f32 %v381_v61, %v380_v4  ;;  %v916_v61 = vld [vmem:[%s1215_s0 + $0x98] sm:$0xff]  ;;  %v921_v4 = vld [vmem:[%s1215_s0 + $0xa0] sm:$0xff]  ;;  %v528_v37 = vsel %vm361_vm0, %v473_v40, 0.0  ;;  %v515_v41 = vmul.f32 %v839_v55, %v839_v55  ;;  %v536_v40 = vsel %vm361_vm0, %v477_v58, 0.0 }
  0x16   :  { %v401_v59 = vsel %vm361_vm0, %v921_v4, 0.0  ;;  %v1041_v55 = vsel %vm361_vm0, %v502_v38, 0.0 }
  0x17   :  { %v384_v13 = vadd.f32 %v383_v5, %v382_v8  ;;  %v395_v5 = vsel %vm361_vm0, %v900_v25, 0.0  ;;  %v469_v8 = vmul.f32 %v653_v2, %v653_v2  ;;  %v399_v2 = vsel %vm361_vm0, %v916_v61, 0.0 }
  0x19   :  { %v386_v26 = vadd.f32 %v385_v10, %v384_v13  ;;  %v934_v10 = vld [vmem:[%s1215_s0 + $0xa8] sm:$0xff]  ;;  %v939_v13 = vld [vmem:[%s1215_s0 + $0xb0] sm:$0xff]  ;;  %v520_v9 = vsel %vm361_vm0, %v469_v8, 0.0 }
  0x1a   :  { %v403_v53 = vsel %vm361_vm0, %v934_v10, 0.0  ;;  %v521_v31 = vadd.f32 %v520_v9, %v519_v34  ;;  %v506_v34 = vmul.f32 %v755_v35, %v755_v35  ;;  %v512_v35 = vmul.f32 %v809_v48, %v809_v48 }
  0x1b   :  { %v388_v62 = vadd.f32 %v387_v16, %v386_v26  ;;  %v961_v16 = vsel %vm361_vm0, %v939_v13, 0.0  ;;  %v965_v26 = vsel %vm361_vm0, %v944_v63, 0.0  ;;  %v991_v63 = vmul.f32 %v173_v7, %v173_v7 }
  0x1c   :  { %v505_v7 = vmul.f32 %v738_v30, %v738_v30  ;;  %v1053_v58 = vsel %vm361_vm0, %v506_v34, 0.0  ;;  %v1059_v9 = vsel %vm361_vm0, %v508_v24, 0.0  ;;  %v538_v34 = vsel %vm361_vm0, %v988_v33, 0.0  ;;  %v188_v33 = vld [vmem:[%s1215_s0 + $0xd8] sm:$0xff] }
  0x1d   :  { %v390_v51 = vadd.f32 %v389_v27, %v388_v62  ;;  %v475_v27 = vmul.f32 %v697_v19, %v697_v19  ;;  %v501_v19 = vmul.f32 %v712_v23, %v712_v23  ;;  %v507_v23 = vmul.f32 %v760_v36, %v760_v36 }
  0x1e   :  { %v513_v36 = vmul.f32 %v814_v49, %v814_v49 }
  0x1f   :  { %v392_v62 = vadd.f32 %v391_v0, %v390_v51  ;;  %v500_v51 = vmul.f32 %v707_v22, %v707_v22  ;;  %v523_v22 = vadd.f32 %v522_v15, %v521_v31  ;;  %v511_v0 = vmul.f32 %v792_v43, %v792_v43 }
  0x20   :  { %v530_v43 = vsel %vm361_vm0, %v474_v39, 0.0  ;;  %v532_v48 = vsel %vm361_vm0, %v475_v27, 0.0  ;;  %v1047_v39 = vsel %vm361_vm0, %v504_v52, 0.0  ;;  %v1056_v27 = vsel %vm361_vm0, %v507_v23, 0.0  ;;  %v1101_v23 = vld [vmem:[%s1215_s0 + $0xd0] sm:$0xff] }
  0x21   :  { %v394_v18 = vadd.f32 %v393_v1, %v392_v62  ;;  %v525_v30 = vadd.f32 %v524_v54, %v523_v22  ;;  %v516_v1 = vmul.f32 %v844_v56, %v844_v56  ;;  %v1044_v56 = vsel %vm361_vm0, %v503_v20, 0.0 }
  0x22   :  { %v1050_v62 = vsel %vm361_vm0, %v505_v7, 0.0  ;;  %v1065_v15 = vsel %vm361_vm0, %v510_v29, 0.0  ;;  %v1072_v31 = vsel %vm361_vm0, %v512_v35, 0.0  ;;  %v1081_v20 = vsel %vm361_vm0, %v515_v41, 0.0 }
  0x23   :  { %v396_v3 = vadd.f32 %v395_v5, %v394_v18  ;;  %v527_v42 = vadd.f32 %v526_v28, %v525_v30  ;;  %v534_v5 = vsel %vm361_vm0, %v476_v12, 0.0  ;;  %v1062_v12 = vsel %vm361_vm0, %v509_v44, 0.0 }
  0x24   :  { %v1084_v54 = vsel %vm361_vm0, %v516_v1, 0.0  ;;  %v480_v22 = vmul.f32 %v878_v11, %v878_v11  ;;  %v540_v11 = vsel %vm361_vm0, %v991_v63, 0.0  ;;  %v415_v30 = vsel %vm361_vm0, %v188_v33, 0.0 }
  0x25   :  { %v398_v46 = vadd.f32 %v397_v60, %v396_v3  ;;  %v514_v60 = vmul.f32 %v819_v50, %v819_v50  ;;  %v529_v8 = vadd.f32 %v528_v37, %v527_v42  ;;  %v1038_v50 = vsel %vm361_vm0, %v501_v19, 0.0 }
  0x26   :  { %v1075_v19 = vsel %vm361_vm0, %v513_v36, 0.0  ;;  %v483_v37 = vmul.f32 %v895_v21, %v895_v21  ;;  %v484_v1 = vmul.f32 %v900_v25, %v900_v25 }
  0x27   :  { %v400_v45 = vadd.f32 %v399_v2, %v398_v46  ;;  %v1035_v2 = vsel %vm361_vm0, %v500_v51, 0.0  ;;  %v1069_v51 = vsel %vm361_vm0, %v511_v0, 0.0  ;;  %v1078_v38 = vsel %vm361_vm0, %v514_v60, 0.0  ;;  %v190_v60 = vld [vmem:[%s1215_s0 + $0xe8] sm:$0xff] }
  0x28   :  { %v481_v46 = vmul.f32 %v883_v14, %v883_v14  ;;  %v542_v0 = vsel %vm361_vm0, %v480_v22, 0.0  ;;  %v189_v14 = vld [vmem:[%s1215_s0 + $0xe0] sm:$0xff]  ;;  %v419_v42 = vsel %vm361_vm0, %v190_v60, 0.0 }
  0x29   :  { %v402_v49 = vadd.f32 %v401_v59, %v400_v45  ;;  %v531_v59 = vadd.f32 %v530_v43, %v529_v8  ;;  %v417_v63 = vsel %vm361_vm0, %v189_v14, 0.0  ;;  %v485_v8 = vmul.f32 %v911_v57, %v911_v57 }
  0x2a   :  { %v544_v45 = vsel %vm361_vm0, %v481_v46, 0.0 }
  0x2b   :  { %v404_v6 = vadd.f32 %v403_v53, %v402_v49  ;;  %v533_v18 = vadd.f32 %v532_v48, %v531_v59  ;;  %v191_v48 = vld [vmem:[%s1215_s0 + $0xf0] sm:$0xff] }
  0x2c   :  { %v421_v49 = vsel %vm361_vm0, %v191_v48, 0.0 }
  0x2d   :  { %v406_v53 = vadd.f32 %v961_v16, %v404_v6  ;;  %v1089_v16 = vld [vmem:[%s1215_s0 + $0xc8] sm:$0xff]  ;;  %v535_v52 = vadd.f32 %v534_v5, %v533_v18  ;;  %v192_v6 = vld [vmem:[%s1215_s0 + $0xf8] sm:$0xff]  ;;  %v486_v18 = vmul.f32 %v916_v61, %v916_v61  ;;  %v488_v61 = vmul.f32 %v934_v10, %v934_v10 }
  0x2e   :  { %v411_v7 = vsel %vm361_vm0, %v1089_v16, 0.0 }
  0x2f   :  { %v408_v3 = vadd.f32 %v965_v26, %v406_v53  ;;  %v537_v28 = vadd.f32 %v536_v40, %v535_v52  ;;  %v413_v26 = vsel %vm361_vm0, %v1101_v23, 0.0  ;;  %v548_v40 = vsel %vm361_vm0, %v483_v37, 0.0  ;;  %v193_v52 = vld [vmem:[%s1215_s0 + $0x100] sm:$0xff] }
  0x30   :  { %v423_v53 = vsel %vm361_vm0, %v192_v6, 0.0  ;;  %v425_v22 = vsel %vm361_vm0, %v193_v52, 0.0  ;;  %v554_v46 = vsel %vm361_vm0, %v486_v18, 0.0  ;;  %v494_v18 = vmul.f32 %v188_v33, %v188_v33 }
  0x31   :  { %v410_v24 = vadd.f32 %v971_v47, %v408_v3  ;;  %v539_v29 = vadd.f32 %v538_v34, %v537_v28  ;;  %v482_v47 = vmul.f32 %v890_v17, %v890_v17  ;;  %v550_v3 = vsel %vm361_vm0, %v484_v1, 0.0 }
  0x32   :  { %v487_v34 = vmul.f32 %v921_v4, %v921_v4  ;;  %v1237_v4 = vld [vmem:[#allocation18_spill] sm:$0xff] }
  0x33   :  { %v412_v44 = vadd.f32 %v411_v7, %v410_v24  ;;  %v541_v36 = vadd.f32 %v540_v11, %v539_v29  ;;  %v546_v43 = vsel %vm361_vm0, %v482_v47, 0.0  ;;  %v552_v24 = vsel %vm361_vm0, %v485_v8, 0.0 }
  0x34   :  { %v489_v29 = vmul.f32 %v939_v13, %v939_v13  ;;  %v493_v8 = vmul.f32 %v1101_v23, %v1101_v23  ;;  %v570_v23 = vsel %vm361_vm0, %v494_v18, 0.0  ;;  %v1254_v18 = vld [vmem:[#allocation17_spill] sm:$0xff] }
  0x35   :  { %v414_v35 = vadd.f32 %v413_v26, %v412_v44  ;;  %v543_v41 = vadd.f32 %v542_v0, %v541_v36  ;;  %v558_v36 = vsel %vm361_vm0, %v488_v61, 0.0  ;;  %v496_v61 = vmul.f32 %v190_v60, %v190_v60 }
  0x37   :  { %v416_v17 = vadd.f32 %v415_v30, %v414_v35  ;;  %v545_v5 = vadd.f32 %v544_v45, %v543_v41  ;;  %v556_v30 = vsel %vm361_vm0, %v487_v34, 0.0  ;;  %v490_v35 = vmul.f32 %v1237_v4, %v1237_v4  ;;  %v1239_v45 = vld [vmem:[#allocation19_spill] sm:$0xff] }
  0x38   :  { %v560_v41 = vsel %vm361_vm0, %v489_v29, 0.0  ;;  %v568_v34 = vsel %vm361_vm0, %v493_v8, 0.0  ;;  %v497_v29 = vmul.f32 %v191_v48, %v191_v48  ;;  %v498_v4 = vmul.f32 %v192_v6, %v192_v6  ;;  %v1249_v48 = vld [vmem:[#allocation12_spill] sm:$0xff]  ;;  %v1252_v8 = vld [vmem:[#allocation15_spill] sm:$0xff] }
  0x39   :  { %v418_v21 = vadd.f32 %v417_v63, %v416_v17  ;;  %v547_v59 = vadd.f32 %v546_v43, %v545_v5  ;;  %v1238_v63 = vld [vmem:[#allocation2_spill] sm:$0xff]  ;;  %v491_v17 = vmul.f32 %v1239_v45, %v1239_v45  ;;  %v562_v43 = vsel %vm361_vm0, %v490_v35, 0.0 }
  0x3a   :  { %v1247_v35 = vld [vmem:[#allocation10_spill] sm:$0xff]  ;;  %v576_v60 = vsel %vm361_vm0, %v497_v29, 0.0 }
  0x3b   :  { %v420_v25 = vadd.f32 %v419_v42, %v418_v21  ;;  %v549_v7 = vadd.f32 %v548_v40, %v547_v59  ;;  %v1240_v42 = vld [vmem:[#allocation3_spill] sm:$0xff]  ;;  %v1241_v21 = vld [vmem:[#allocation4_spill] sm:$0xff]  ;;  %v564_v40 = vsel %vm361_vm0, %v491_v17, 0.0 }
  0x3d   :  { %v422_v57 = vadd.f32 %v421_v49, %v420_v25  ;;  %v551_v26 = vadd.f32 %v550_v3, %v549_v7  ;;  %v1242_v25 = vld [vmem:[#allocation5_spill] sm:$0xff] }
  0x3f   :  { %v424_v28 = vadd.f32 %v423_v53, %v422_v57  ;;  %v553_v44 = vadd.f32 %v552_v24, %v551_v26  ;;  %v1243_v57 = vld [vmem:[#allocation6_spill] sm:$0xff]  ;;  %v1244_v24 = vld [vmem:[#allocation7_spill] sm:$0xff] }
  0x41   :  { %v426_v11 = vadd.f32 %v425_v22, %v424_v28  ;;  %v555_v0 = vadd.f32 %v554_v46, %v553_v44  ;;  %v1245_v46 = vld [vmem:[#allocation8_spill] sm:$0xff] }
  0x43   :  { %v428_v47 = vadd.f32 %v742_v32, %v426_v11  ;;  %v557_v10 = vadd.f32 %v556_v30, %v555_v0  ;;  %v492_v32 = vmul.f32 %v1089_v16, %v1089_v16  ;;  %v495_v16 = vmul.f32 %v189_v14, %v189_v14  ;;  %v1246_v30 = vld [vmem:[#allocation9_spill] sm:$0xff] }
  0x44   :  { %v574_v14 = vsel %vm361_vm0, %v496_v61, 0.0 }
  0x45   :  { %v430_v37 = vadd.f32 %v1238_v63, %v428_v47  ;;  %v559_v1 = vadd.f32 %v558_v36, %v557_v10  ;;  %v566_v3 = vsel %vm361_vm0, %v492_v32, 0.0  ;;  %v572_v33 = vsel %vm361_vm0, %v495_v16, 0.0  ;;  %v1248_v10 = vld [vmem:[#allocation11_spill] sm:$0xff]  ;;  %v1250_v32 = vld [vmem:[#allocation13_spill] sm:$0xff] }
  0x47   :  { %v432_v13 = vadd.f32 %v1240_v42, %v430_v37  ;;  %v561_v49 = vadd.f32 %v560_v41, %v559_v1  ;;  %v499_v37 = vmul.f32 %v193_v52, %v193_v52  ;;  %v578_v41 = vsel %vm361_vm0, %v498_v4, 0.0 }
  0x49   :  { %v434_v5 = vadd.f32 %v1241_v21, %v432_v13  ;;  %v563_v53 = vadd.f32 %v562_v43, %v561_v49  ;;  %v580_v1 = vsel %vm361_vm0, %v499_v37, 0.0  ;;  %v1251_v21 = vld [vmem:[#allocation14_spill] sm:$0xff] }
  0x4b   :  { %v436_v59 = vadd.f32 %v1242_v25, %v434_v5  ;;  %v565_v22 = vadd.f32 %v564_v40, %v563_v53  ;;  %v1253_v25 = vld [vmem:[#allocation16_spill] sm:$0xff] }
  0x4d   :  { %v438_v7 = vadd.f32 %v1243_v57, %v436_v59  ;;  %v567_v26 = vadd.f32 %v566_v3, %v565_v22 }
  0x4f   :  { %v440_v28 = vadd.f32 %v1244_v24, %v438_v7  ;;  %v569_v44 = vadd.f32 %v568_v34, %v567_v26 }
  0x51   :  { %v442_v11 = vadd.f32 %v1245_v46, %v440_v28  ;;  %v571_v0 = vadd.f32 %v570_v23, %v569_v44 }
  0x53   :  { %v444_v47 = vadd.f32 %v1246_v30, %v442_v11  ;;  %v573_v63 = vadd.f32 %v572_v33, %v571_v0 }
  0x55   :  { %v446_v36 = vadd.f32 %v1247_v35, %v444_v47  ;;  %v575_v17 = vadd.f32 %v574_v14, %v573_v63 }
  0x57   :  { %v448_v45 = vadd.f32 %v1248_v10, %v446_v36  ;;  %v577_v13 = vadd.f32 %v576_v60, %v575_v17 }
  0x59   :  { %v450_v42 = vadd.f32 %v1249_v48, %v448_v45  ;;  %v579_v43 = vadd.f32 %v578_v41, %v577_v13 }
  0x5b   :  { %v452_v6 = vadd.f32 %v1250_v32, %v450_v42  ;;  %v581_v49 = vadd.f32 %v580_v1, %v579_v43 }
  0x5d   :  { %v454_v5 = vadd.f32 %v1251_v21, %v452_v6  ;;  %v583_v40 = vadd.f32 %v1035_v2, %v581_v49 }
  0x5f   :  { %v456_v52 = vadd.f32 %v1252_v8, %v454_v5  ;;  %v585_v53 = vadd.f32 %v1038_v50, %v583_v40 }
  0x61   :  { %v458_v59 = vadd.f32 %v1253_v25, %v456_v52  ;;  %v587_v57 = vadd.f32 %v1041_v55, %v585_v53 }
  0x63   :  { %v460_v3 = vadd.f32 %v1254_v18, %v458_v59  ;;  %v589_v7 = vadd.f32 %v1044_v56, %v587_v57 }
  0x65   :  { %v591_v22 = vadd.f32 %v1047_v39, %v589_v7  ;;  %v461_v26 = vrot.slane %v460_v3, 4 }
  0x67   :  { %v593_v16 = vadd.f32 %v1050_v62, %v591_v22  ;;  %v462_v56 = vadd.f32 %v461_v26, %v460_v3 }
  0x69   :  { %v595_v34 = vadd.f32 %v1053_v58, %v593_v16  ;;  %v463_v23 = vrot.slane %v462_v56, 2 }
  0x6b   :  { %v597_v24 = vadd.f32 %v1056_v27, %v595_v34 }
  0x6d   :  { %v599_v2 = vadd.f32 %v1059_v9, %v597_v24  ;;  %v464_v9 = vadd.f32 %v463_v23, %v462_v56 }
  0x6f   :  { %v601_v28 = vadd.f32 %v1062_v12, %v599_v2  ;;  %v465_v11 = vrot.slane %v464_v9, 1 }
  0x71   :  { %v603_v50 = vadd.f32 %v1065_v15, %v601_v28  ;;  %v466_v29 = vadd.f32 %v465_v11, %v464_v9 }
  0x73   :  { %v605_v61 = vadd.f32 %v1069_v51, %v603_v50 }
  0x75   :  { %v607_v55 = vadd.f32 %v1072_v31, %v605_v61 }
  0x77   :  { %v609_v39 = vadd.f32 %v1075_v19, %v607_v55 }
  0x79   :  { %v611_v62 = vadd.f32 %v1078_v38, %v609_v39 }
  0x7b   :  { %v613_v58 = vadd.f32 %v1081_v20, %v611_v62 }
  0x7d   :  { %v615_v27 = vadd.f32 %v1084_v54, %v613_v58 }
  0x7f   :  { %v616_v46 = vrot.slane %v615_v27, 4 }
  0x81   :  { %v617_v12 = vadd.f32 %v616_v46, %v615_v27 }
  0x83   :  { %v618_v15 = vrot.slane %v617_v12, 2 }
  0x85   :  { %v619_v44 = vadd.f32 %v618_v15, %v617_v12 }
  0x87   :  { %v620_v51 = vrot.slane %v619_v44, 1 }
  0x89   :  { %v621_v31 = vadd.f32 %v620_v51, %v619_v44 }
  0x8b   :  { %v623_v33 = vsel %vm622_vm1, %v466_v29, %v621_v31 }
  0x8c   :  { %625 = vst.msk [vmem:[%s1216_s1] sm:$0x3] %vm624_vm2, %v623_v33 }

// kernel: generator_forward.8
= control target key start
LH: loop header
LB: loop body
LE: loop exit
PB: predicated region body
PF: predicated region fallthrough
CT: control target
= control target key end

     0   :  { %vm538_vm0 = vcmask 130048   ;;  %vm1004_vm1 = vcmask 261120   ;;  %vm1315_vm2 = vcmask 1040384   ;;  %vm1317_vm3 = vcmask 254976   ;;  %s2310_s3 = inlined_call_operand.vmem [shape: f32[16,32], index: 3, kind: input, shape index: {}]   ;;  %s2311_s0 = inlined_call_operand.vmem [shape: f32[400,16], index: 0, kind: input, shape index: {}]   ;;  %s2312_s1 = inlined_call_operand.vmem [shape: f32[1,16], index: 1, kind: input, shape index: {}]   ;;  %s2313_s2 = inlined_call_operand.vmem [shape: f32[1,16], index: 2, kind: input, shape index: {}]   ;;  %s2314_s4 = inlined_call_operand.vmem [shape: f32[400,32], index: 4, kind: output, shape index: {0}]   ;;  %s2315_s5 = inlined_call_operand.vmem [shape: f32[1,2,32], index: 5, kind: output, shape index: {1}]  }
   0x1   :  { %v537_v0 = vld [vmem:[%s2310_s3 + $0x8] sm:$0xff]  ;;  %v536_v1 = vld [vmem:[%s2310_s3] sm:$0xff]  ;;  %v124_v8 = vld [vmem:[%s2311_s0 + $0x10] sm:$0xff] }
   0x2   :  { %v122_v2 = vld [vmem:[%s2311_s0] sm:$0xff]  ;;  %1431 = vmatprep.subr.mxu0 %v537_v0  ;;  %v123_v5 = vld [vmem:[%s2311_s0 + $0x8] sm:$0xff]  ;;  %1510 = vmatprep.subr.mxu1 %v537_v0  ;;  %v125_v9 = vld [vmem:[%s2311_s0 + $0x18] sm:$0xff] }
   0x3   :  { %v1556_v3 = vld [vmem:[%s2312_s1] ss:$0 sm:$0xff]  ;;  %1432 = vmatpush3.msra.mxu0 %v537_v0  ;;  %1512 = vmatpush3.msra.mxu1 %v537_v0  ;;  %v127_v14 = vld [vmem:[%s2311_s0 + $0x28] sm:$0xff]  ;;  %v128_v15 = vld [vmem:[%s2311_s0 + $0x30] sm:$0xff] }
   0x4   :  { %v1561_v4 = vld [vmem:[%s2313_s2] ss:$0 sm:$0xff]  ;;  %v179_v6 = vmul.f32 %v1556_v3, %v122_v2  ;;  %v180_v7 = vmul.f32 %v1556_v3, %v123_v5  ;;  %1433 = vmatprep.subr.mxu0 %v536_v1  ;;  %v181_v11 = vmul.f32 %v1556_v3, %v124_v8  ;;  %v182_v12 = vmul.f32 %v1556_v3, %v125_v9  ;;  %v129_v25 = vld [vmem:[%s2311_s0 + $0x38] sm:$0xff]  ;;  %v131_v34 = vld [vmem:[%s2311_s0 + $0x48] sm:$0xff] }
   0x5   :  { %v126_v10 = vld [vmem:[%s2311_s0 + $0x20] sm:$0xff]  ;;  %1511 = vmatprep.subr.mxu1 %v536_v1  ;;  %1434 = vmatpush3.msra.mxu0 %v536_v1  ;;  %v184_v20 = vmul.f32 %v1556_v3, %v127_v14  ;;  %v185_v24 = vmul.f32 %v1556_v3, %v128_v15  ;;  %v186_v30 = vmul.f32 %v1556_v3, %v129_v25  ;;  %v132_v35 = vld [vmem:[%s2311_s0 + $0x50] sm:$0xff]  ;;  %v133_v39 = vld [vmem:[%s2311_s0 + $0x58] sm:$0xff] }
   0x6   :  { %v183_v13 = vmul.f32 %v1556_v3, %v126_v10  ;;  %v236_v16 = vadd.f32 %v1561_v4, %v179_v6  ;;  %v237_v17 = vadd.f32 %v1561_v4, %v180_v7  ;;  %v238_v18 = vadd.f32 %v1561_v4, %v181_v11  ;;  %1513 = vmatpush3.msra.mxu1 %v536_v1  ;;  %v130_v27 = vld [vmem:[%s2311_s0 + $0x40] sm:$0xff]  ;;  %v135_v47 = vld [vmem:[%s2311_s0 + $0x68] sm:$0xff]  ;;  %v136_v48 = vld [vmem:[%s2311_s0 + $0x70] sm:$0xff] }
   0x7   :  { %v239_v19 = vadd.f32 %v1561_v4, %v182_v12  ;;  %v241_v29 = vadd.f32 %v1561_v4, %v184_v20  ;;  %v242_v32 = vadd.f32 %v1561_v4, %v185_v24  ;;  %v187_v33 = vmul.f32 %v1556_v3, %v130_v27  ;;  %v134_v43 = vld [vmem:[%s2311_s0 + $0x60] sm:$0xff]  ;;  %v148_v52 = vld [vmem:[%s2311_s0 + $0xd0] sm:$0xff]  ;;  %v149_v53 = vld [vmem:[%s2311_s0 + $0xd8] sm:$0xff] }
   0x8   :  { %v286_v21 = vmax.f32 %v236_v16, 0.0  ;;  %v287_v22 = vmax.f32 %v237_v17, 0.0  ;;  %v240_v23 = vadd.f32 %v1561_v4, %v183_v13  ;;  %v288_v26 = vmax.f32 %v238_v18, 0.0  ;;  %v150_v54 = vld [vmem:[%s2311_s0 + $0xe0] sm:$0xff]  ;;  %v151_v55 = vld [vmem:[%s2311_s0 + $0xe8] sm:$0xff]  ;;  %v152_v56 = vld [vmem:[%s2311_s0 + $0xf0] sm:$0xff] }
   0x9   :  { %v289_v28 = vmax.f32 %v239_v19, 0.0  ;;  %v291_v36 = vmax.f32 %v241_v29, 0.0  ;;  %v243_v37 = vadd.f32 %v1561_v4, %v186_v30  ;;  %v188_v38 = vmul.f32 %v1556_v3, %v131_v34  ;;  %v137_v60 = vld [vmem:[%s2311_s0 + $0x78] sm:$0xff]  ;;  %v138_v9 = vld [vmem:[%s2311_s0 + $0x80] sm:$0xff]  ;;  %v140_v30 = vld [vmem:[%s2311_s0 + $0x90] sm:$0xff] }
   0xa   :  { %1435 = vmatprep.mubr.msk.f32.mxu0 %vm538_vm0, %v286_v21  ;;  %v290_v31 = vmax.f32 %v240_v23, 0.0  ;;  %v292_v40 = vmax.f32 %v242_v32, 0.0  ;;  %v244_v41 = vadd.f32 %v1561_v4, %v187_v33  ;;  %v189_v42 = vmul.f32 %v1556_v3, %v132_v35  ;;  %v153_v1 = vld [vmem:[%s2311_s0 + $0xf8] sm:$0xff]  ;;  %v154_v13 = vld [vmem:[%s2311_s0 + $0x100] sm:$0xff] }
   0xb   :  { %1436 = vmatmul.mubr.msk.f32.vlgmr.msra.gmra.mxu0 %vm538_vm0, %v287_v22  ;;  %v190_v44 = vmul.f32 %v1556_v3, %v133_v39  ;;  %v293_v45 = vmax.f32 %v243_v37, 0.0  ;;  %v245_v46 = vadd.f32 %v1561_v4, %v188_v38  ;;  %v191_v51 = vmul.f32 %v1556_v3, %v134_v43  ;;  %v155_v22 = vld [vmem:[%s2311_s0 + $0x108] sm:$0xff] }
   0xc   :  { %1438 = vmatprep.mubr.msk.f32.mxu0 %vm538_vm0, %v288_v26  ;;  %v294_v49 = vmax.f32 %v244_v41, 0.0  ;;  %v246_v50 = vadd.f32 %v1561_v4, %v189_v42  ;;  %v192_v58 = vmul.f32 %v1556_v3, %v135_v47  ;;  %v193_v59 = vmul.f32 %v1556_v3, %v136_v48  ;;  %v139_v26 = vld [vmem:[%s2311_s0 + $0x88] sm:$0xff] }
   0xd   :  { %v247_v57 = vadd.f32 %v1561_v4, %v190_v44  ;;  %v295_v61 = vmax.f32 %v245_v46, 0.0  ;;  %v205_v62 = vmul.f32 %v1556_v3, %v148_v52  ;;  %v206_v63 = vmul.f32 %v1556_v3, %v149_v53  ;;  %v158_v44 = vld [vmem:[%s2311_s0 + $0x120] sm:$0xff]  ;;  %v143_v48 = vld [vmem:[%s2311_s0 + $0xa8] sm:$0xff] }
   0xe   :  { %v207_v0 = vmul.f32 %v1556_v3, %v150_v54  ;;  %v296_v2 = vmax.f32 %v246_v50, 0.0  ;;  %v248_v5 = vadd.f32 %v1561_v4, %v191_v51  ;;  %v208_v6 = vmul.f32 %v1556_v3, %v151_v55  ;;  %v142_v46 = vld [vmem:[%s2311_s0 + $0xa0] sm:$0xff] }
   0xf   :  { %1439 = vmatmul.mubr.msk.f32.gmra.mxu0 %vm538_vm0, %v289_v28  ;;  %v209_v7 = vmul.f32 %v1556_v3, %v152_v56  ;;  %v194_v8 = vmul.f32 %v1556_v3, %v137_v60  ;;  %v262_v10 = vadd.f32 %v1561_v4, %v205_v62  ;;  %v263_v11 = vadd.f32 %v1561_v4, %v206_v63  ;;  %v156_v28 = vld [vmem:[%s2311_s0 + $0x110] sm:$0xff]  ;;  %v159_v56 = vld [vmem:[%s2311_s0 + $0x128] sm:$0xff] }
  0x10   :  { %1441 = vmatprep.mubr.msk.f32.mxu0 %vm538_vm0, %v290_v31  ;;  %v264_v12 = vadd.f32 %v1561_v4, %v207_v0  ;;  %v297_v14 = vmax.f32 %v247_v57, 0.0  ;;  %v249_v15 = vadd.f32 %v1561_v4, %v192_v58  ;;  %v265_v16 = vadd.f32 %v1561_v4, %v208_v6  ;;  %v160_v60 = vld [vmem:[%s2311_s0 + $0x130] sm:$0xff]  ;;  %v171_v63 = vld [vmem:[%s2311_s0 + $0x188] sm:$0xff] }
  0x11   :  { %v210_v17 = vmul.f32 %v1556_v3, %v153_v1  ;;  %v312_v18 = vmax.f32 %v262_v10, 0.0  ;;  %v313_v19 = vmax.f32 %v263_v11, 0.0  ;;  %v266_v21 = vadd.f32 %v1561_v4, %v209_v7  ;;  %v144_v62 = vld [vmem:[%s2311_s0 + $0xb0] sm:$0xff]  ;;  %v145_v1 = vld [vmem:[%s2311_s0 + $0xb8] sm:$0xff] }
  0x12   :  { %v314_v20 = vmax.f32 %v264_v12, 0.0  ;;  %v298_v23 = vmax.f32 %v248_v5, 0.0  ;;  %v250_v24 = vadd.f32 %v1561_v4, %v193_v59  ;;  %v195_v25 = vmul.f32 %v1556_v3, %v138_v9  ;;  %v161_v11 = vld [vmem:[%s2311_s0 + $0x138] sm:$0xff] }
  0x13   :  { %1442 = vmatmul.mubr.msk.f32.gmra.mxu0 %vm538_vm0, %v291_v36  ;;  %v211_v27 = vmul.f32 %v1556_v3, %v154_v13  ;;  %v251_v29 = vadd.f32 %v1561_v4, %v194_v8  ;;  %1474 = vmatprep.mubr.msk.f32.mxu1 %vm538_vm0, %v312_v18  ;;  %v299_v31 = vmax.f32 %v249_v15, 0.0  ;;  %v315_v32 = vmax.f32 %v265_v16, 0.0  ;;  %v141_v36 = vld [vmem:[%s2311_s0 + $0x98] sm:$0xff]  ;;  %v162_v15 = vld [vmem:[%s2311_s0 + $0x140] sm:$0xff] }
  0x14   :  { %1444 = vmatprep.mubr.msk.f32.mxu0 %vm538_vm0, %v292_v40  ;;  %1475 = vmatmul.mubr.msk.f32.vlgmr.msra.gmra.mxu1 %vm538_vm0, %v313_v19  ;;  %v267_v33 = vadd.f32 %v1561_v4, %v210_v17  ;;  %v212_v34 = vmul.f32 %v1556_v3, %v155_v22  ;;  %v196_v35 = vmul.f32 %v1556_v3, %v139_v26  ;;  %v316_v37 = vmax.f32 %v266_v21, 0.0  ;;  %v157_v40 = vld [vmem:[%s2311_s0 + $0x118] sm:$0xff]  ;;  %v146_v19 = vld [vmem:[%s2311_s0 + $0xc0] sm:$0xff] }
  0x15   :  { %1477 = vmatprep.mubr.msk.f32.mxu1 %vm538_vm0, %v314_v20  ;;  %v268_v38 = vadd.f32 %v1561_v4, %v211_v27  ;;  %v213_v39 = vmul.f32 %v1556_v3, %v156_v28  ;;  %v300_v41 = vmax.f32 %v250_v24, 0.0  ;;  %v252_v42 = vadd.f32 %v1561_v4, %v195_v25  ;;  %v163_v28 = vld [vmem:[%s2311_s0 + $0x148] sm:$0xff] }
  0x16   :  { %v197_v43 = vmul.f32 %v1556_v3, %v140_v30  ;;  %v198_v47 = vmul.f32 %v1556_v3, %v141_v36  ;;  %v269_v50 = vadd.f32 %v1561_v4, %v212_v34  ;;  %v214_v51 = vmul.f32 %v1556_v3, %v157_v40 }
  0x17   :  { %1445 = vmatmul.mubr.msk.f32.gmra.mxu0 %vm538_vm0, %v293_v45  ;;  %v301_v45 = vmax.f32 %v251_v29, 0.0  ;;  %v253_v52 = vadd.f32 %v1561_v4, %v196_v35  ;;  %v318_v53 = vmax.f32 %v268_v38, 0.0  ;;  %v270_v54 = vadd.f32 %v1561_v4, %v213_v39 }
  0x18   :  { %1447 = vmatprep.mubr.msk.f32.mxu0 %vm538_vm0, %v294_v49  ;;  %1478 = vmatmul.mubr.msk.f32.gmra.mxu1 %vm538_vm0, %v315_v32  ;;  %v317_v49 = vmax.f32 %v267_v33, 0.0  ;;  %v215_v55 = vmul.f32 %v1556_v3, %v158_v44  ;;  %v302_v57 = vmax.f32 %v252_v42, 0.0  ;;  %v254_v58 = vadd.f32 %v1561_v4, %v197_v43  ;;  %v147_v32 = vld [vmem:[%s2311_s0 + $0xc8] sm:$0xff]  ;;  %v164_v33 = vld [vmem:[%s2311_s0 + $0x150] sm:$0xff]  ;;  %v165_v43 = vld [vmem:[%s2311_s0 + $0x158] sm:$0xff] }
  0x19   :  { %1480 = vmatprep.mubr.msk.f32.mxu1 %vm538_vm0, %v316_v37  ;;  %v199_v59 = vmul.f32 %v1556_v3, %v142_v46  ;;  %v255_v0 = vadd.f32 %v1561_v4, %v198_v47  ;;  %v271_v5 = vadd.f32 %v1561_v4, %v214_v51  ;;  %v216_v6 = vmul.f32 %v1556_v3, %v159_v56  ;;  %v166_v46 = vld [vmem:[%s2311_s0 + $0x160] sm:$0xff] }
  0x1a   :  { %v303_v7 = vmax.f32 %v253_v52, 0.0  ;;  %v320_v8 = vmax.f32 %v270_v54, 0.0  ;;  %v272_v9 = vadd.f32 %v1561_v4, %v215_v55  ;;  %v217_v10 = vmul.f32 %v1556_v3, %v160_v60  ;;  %v167_v55 = vld [vmem:[%s2311_s0 + $0x168] sm:$0xff] }
  0x1b   :  { %1448 = vmatmul.mubr.msk.f32.gmra.mxu0 %vm538_vm0, %v295_v61  ;;  %v200_v61 = vmul.f32 %v1556_v3, %v143_v48  ;;  %v304_v12 = vmax.f32 %v254_v58, 0.0  ;;  %v256_v13 = vadd.f32 %v1561_v4, %v199_v59  ;;  %v228_v16 = vmul.f32 %v1556_v3, %v171_v63 }
  0x1c   :  { %1450 = vmatprep.mubr.msk.f32.mxu0 %vm538_vm0, %v296_v2  ;;  %1481 = vmatmul.mubr.msk.f32.gmra.mxu1 %vm538_vm0, %v317_v49  ;;  %v319_v2 = vmax.f32 %v269_v50, 0.0  ;;  %v202_v18 = vmul.f32 %v1556_v3, %v145_v1  ;;  %v321_v20 = vmax.f32 %v271_v5, 0.0  ;;  %v273_v21 = vadd.f32 %v1561_v4, %v216_v6  ;;  %v169_v1 = vld [vmem:[%s2311_s0 + $0x178] sm:$0xff] }
  0x1d   :  { %1483 = vmatprep.mubr.msk.f32.mxu1 %vm538_vm0, %v318_v53  ;;  %v257_v17 = vadd.f32 %v1561_v4, %v200_v61  ;;  %v218_v22 = vmul.f32 %v1556_v3, %v161_v11  ;;  %v305_v24 = vmax.f32 %v255_v0, 0.0  ;;  %v322_v25 = vmax.f32 %v272_v9, 0.0 }
  0x1e   :  { %v274_v26 = vadd.f32 %v1561_v4, %v217_v10  ;;  %v219_v27 = vmul.f32 %v1556_v3, %v162_v15  ;;  %v306_v29 = vmax.f32 %v256_v13, 0.0  ;;  %v259_v34 = vadd.f32 %v1561_v4, %v202_v18 }
  0x1f   :  { %1451 = vmatmul.mubr.msk.f32.gmra.mxu0 %vm538_vm0, %v297_v14  ;;  %v201_v14 = vmul.f32 %v1556_v3, %v144_v62  ;;  %v307_v35 = vmax.f32 %v257_v17, 0.0  ;;  %v323_v36 = vmax.f32 %v273_v21, 0.0  ;;  %v275_v37 = vadd.f32 %v1561_v4, %v218_v22 }
  0x20   :  { %1453 = vmatprep.mubr.msk.f32.mxu0 %vm538_vm0, %v298_v23  ;;  %1484 = vmatmul.mubr.msk.f32.gmra.mxu1 %vm538_vm0, %v319_v2  ;;  %v1782_v23 = vadd.f32 %v1561_v4, %v228_v16  ;;  %v220_v38 = vmul.f32 %v1556_v3, %v163_v28  ;;  %v204_v39 = vmul.f32 %v1556_v3, %v147_v32  ;;  %v324_v40 = vmax.f32 %v274_v26, 0.0  ;;  %v170_v2 = vld [vmem:[%s2311_s0 + $0x180] sm:$0xff] }
  0x21   :  { %1486 = vmatprep.mubr.msk.f32.mxu1 %vm538_vm0, %v320_v8  ;;  %v258_v30 = vadd.f32 %v1561_v4, %v201_v14  ;;  %v221_v42 = vmul.f32 %v1556_v3, %v164_v33  ;;  %v309_v47 = vmax.f32 %v259_v34, 0.0  ;;  %v325_v48 = vmax.f32 %v275_v37, 0.0 }
  0x22   :  { %v277_v49 = vadd.f32 %v1561_v4, %v220_v38  ;;  %v222_v50 = vmul.f32 %v1556_v3, %v165_v43  ;;  %v261_v51 = vadd.f32 %v1561_v4, %v204_v39  ;;  %v223_v54 = vmul.f32 %v1556_v3, %v166_v46 }
  0x23   :  { %1454 = vmatmul.mubr.msk.f32.gmra.mxu0 %vm538_vm0, %v299_v31  ;;  %v203_v31 = vmul.f32 %v1556_v3, %v146_v19  ;;  %v308_v44 = vmax.f32 %v258_v30, 0.0  ;;  %v278_v53 = vadd.f32 %v1561_v4, %v221_v42  ;;  %v224_v60 = vmul.f32 %v1556_v3, %v167_v55 }
  0x24   :  { %1456 = vmatprep.mubr.msk.f32.mxu0 %vm538_vm0, %v300_v41  ;;  %1487 = vmatmul.mubr.msk.f32.gmra.mxu1 %vm538_vm0, %v321_v20  ;;  %v276_v41 = vadd.f32 %v1561_v4, %v219_v27  ;;  %v327_v58 = vmax.f32 %v277_v49, 0.0  ;;  %v279_v59 = vadd.f32 %v1561_v4, %v222_v50  ;;  %v311_v61 = vmax.f32 %v261_v51, 0.0 }
  0x25   :  { %1489 = vmatprep.mubr.msk.f32.mxu1 %vm538_vm0, %v322_v25  ;;  %v328_v62 = vmax.f32 %v278_v53, 0.0  ;;  %v280_v63 = vadd.f32 %v1561_v4, %v223_v54  ;;  %v281_v6 = vadd.f32 %v1561_v4, %v224_v60  ;;  %v227_v10 = vmul.f32 %v1556_v3, %v170_v2 }
  0x26   :  { %v326_v52 = vmax.f32 %v276_v41, 0.0  ;;  %v329_v5 = vmax.f32 %v279_v59, 0.0 }
  0x27   :  { %1457 = vmatmul.mubr.msk.f32.gmra.mxu0 %vm538_vm0, %v301_v45  ;;  %v260_v45 = vadd.f32 %v1561_v4, %v203_v31  ;;  %v330_v8 = vmax.f32 %v280_v63, 0.0  ;;  %v331_v11 = vmax.f32 %v281_v6, 0.0  ;;  %v284_v14 = vadd.f32 %v1561_v4, %v227_v10 }
  0x28   :  { %1459 = vmatprep.mubr.msk.f32.mxu0 %vm538_vm0, %v302_v57  ;;  %1490 = vmatmul.mubr.msk.f32.gmra.mxu1 %vm538_vm0, %v323_v36  ;;  %v168_v57 = vld [vmem:[%s2311_s0 + $0x170] sm:$0xff] }
  0x29   :  { %1492 = vmatprep.mubr.msk.f32.mxu1 %vm538_vm0, %v324_v40  ;;  %v310_v56 = vmax.f32 %v260_v45, 0.0  ;;  %v225_v0 = vmul.f32 %v1556_v3, %v168_v57  ;;  %v334_v16 = vmax.f32 %v284_v14, 0.0 }
  0x2b   :  { %1460 = vmatmul.mubr.msk.f32.gmra.mxu0 %vm538_vm0, %v303_v7  ;;  %v226_v7 = vmul.f32 %v1556_v3, %v169_v1  ;;  %v282_v9 = vadd.f32 %v1561_v4, %v225_v0  ;;  %v335_v3 = vmax.f32 %v1782_v23, 0.0 }
  0x2c   :  { %1462 = vmatprep.mubr.msk.f32.mxu0 %vm538_vm0, %v304_v12  ;;  %1493 = vmatmul.mubr.msk.f32.gmra.mxu1 %vm538_vm0, %v325_v48 }
  0x2d   :  { %1495 = vmatprep.mubr.msk.f32.mxu1 %vm538_vm0, %v326_v52  ;;  %v283_v12 = vadd.f32 %v1561_v4, %v226_v7  ;;  %v332_v13 = vmax.f32 %v282_v9, 0.0 }
  0x2f   :  { %1463 = vmatmul.mubr.msk.f32.gmra.mxu0 %vm538_vm0, %v305_v24  ;;  %v333_v15 = vmax.f32 %v283_v12, 0.0 }
  0x30   :  { %1465 = vmatprep.mubr.msk.f32.mxu0 %vm538_vm0, %v306_v29  ;;  %1496 = vmatmul.mubr.msk.f32.gmra.mxu1 %vm538_vm0, %v327_v58 }
  0x31   :  { %1498 = vmatprep.mubr.msk.f32.mxu1 %vm538_vm0, %v328_v62 }
  0x33   :  { %1466 = vmatmul.mubr.msk.f32.gmra.mxu0 %vm538_vm0, %v307_v35 }
  0x34   :  { %1468 = vmatprep.mubr.msk.f32.mxu0 %vm538_vm0, %v308_v44  ;;  %1499 = vmatmul.mubr.msk.f32.gmra.mxu1 %vm538_vm0, %v329_v5 }
  0x35   :  { %1501 = vmatprep.mubr.msk.f32.mxu1 %vm538_vm0, %v330_v8 }
  0x37   :  { %1469 = vmatmul.mubr.msk.f32.gmra.mxu0 %vm538_vm0, %v309_v47 }
  0x38   :  { %1471 = vmatprep.mubr.msk.f32.mxu0 %vm538_vm0, %v310_v56  ;;  %1502 = vmatmul.mubr.msk.f32.gmra.mxu1 %vm538_vm0, %v331_v11 }
  0x39   :  { %1504 = vmatprep.mubr.msk.f32.mxu1 %vm538_vm0, %v332_v13 }
  0x3b   :  { %1472 = vmatmul.mubr.msk.f32.gmra.mxu0 %vm538_vm0, %v311_v61 }
  0x3c   :  { %1505 = vmatmul.mubr.msk.f32.gmra.mxu1 %vm538_vm0, %v333_v15 }
  0x3d   :  { %1507 = vmatprep.mubr.msk.f32.mxu1 %vm538_vm0, %v334_v16 }
  0x40   :  { %1508 = vmatmul.mubr.msk.f32.gmra.mxu1 %vm538_vm0, %v335_v3 }
  0xcb   :  { %v1437_v17 = vpop.f32.mrf.mxu0 }
  0xcc   :  { %1006 = vst.msk [vmem:[%s2314_s4 + $0x8] sm:$0xff] %vm1004_vm1, %v1437_v17  ;;  %v1161_v18 = vmul.f32 %v1437_v17, %v1437_v17  ;;  %v1056_v22 = vsel %vm1004_vm1, %v1437_v17, 0.0 }
  0xcd   :  { %v755_v4 = vpop.f32.mrf.mxu0 }
  0xce   :  { %1005 = vst.msk [vmem:[%s2314_s4] sm:$0xff] %vm1004_vm1, %v755_v4  ;;  %v1055_v19 = vsel %vm1004_vm1, %v755_v4, 0.0  ;;  %v1160_v20 = vmul.f32 %v755_v4, %v755_v4  ;;  %v1211_v26 = vsel %vm1004_vm1, %v1161_v18, 0.0 }
  0xcf   :  { %v1440_v21 = vpop.f32.mrf.mxu0  ;;  %v1057_v24 = vadd.f32 %v1056_v22, %v1055_v19 }
  0xd0   :  { %v1210_v23 = vsel %vm1004_vm1, %v1160_v20, 0.0  ;;  %1008 = vst.msk [vmem:[%s2314_s4 + $0x18] sm:$0xff] %vm1004_vm1, %v1440_v21  ;;  %v1163_v27 = vmul.f32 %v1440_v21, %v1440_v21  ;;  %v1060_v33 = vsel %vm1004_vm1, %v1440_v21, 0.0 }
  0xd1   :  { %v765_v25 = vpop.f32.mrf.mxu0  ;;  %v1212_v30 = vadd.f32 %v1211_v26, %v1210_v23 }
  0xd2   :  { %1007 = vst.msk [vmem:[%s2314_s4 + $0x10] sm:$0xff] %vm1004_vm1, %v765_v25  ;;  %v1058_v28 = vsel %vm1004_vm1, %v765_v25, 0.0  ;;  %v1162_v29 = vmul.f32 %v765_v25, %v765_v25  ;;  %v1215_v38 = vsel %vm1004_vm1, %v1163_v27, 0.0 }
  0xd3   :  { %v1059_v31 = vadd.f32 %v1058_v28, %v1057_v24  ;;  %v1443_v32 = vpop.f32.mrf.mxu0 }
  0xd4   :  { %v1213_v34 = vsel %vm1004_vm1, %v1162_v29, 0.0  ;;  %1010 = vst.msk [vmem:[%s2314_s4 + $0x28] sm:$0xff] %vm1004_vm1, %v1443_v32  ;;  %v1165_v39 = vmul.f32 %v1443_v32, %v1443_v32  ;;  %v1064_v45 = vsel %vm1004_vm1, %v1443_v32, 0.0  ;;  %v1920_v2 = vpop.f32.mrf.mxu1 }
  0xd5   :  { %v1214_v35 = vadd.f32 %v1213_v34, %v1212_v30  ;;  %v775_v36 = vpop.f32.mrf.mxu0  ;;  %v1061_v37 = vadd.f32 %v1060_v33, %v1059_v31  ;;  %1032 = vst.msk [vmem:[%s2314_s4 + $0xd8] sm:$0xff] %vm1004_vm1, %v1920_v2 }
  0xd6   :  { %1009 = vst.msk [vmem:[%s2314_s4 + $0x20] sm:$0xff] %vm1004_vm1, %v775_v36  ;;  %v1062_v40 = vsel %vm1004_vm1, %v775_v36, 0.0  ;;  %v1164_v41 = vmul.f32 %v775_v36, %v775_v36  ;;  %v1219_v50 = vsel %vm1004_vm1, %v1165_v39, 0.0  ;;  %v1933_v10 = vpop.f32.mrf.mxu1 }
  0xd7   :  { %v1063_v42 = vadd.f32 %v1062_v40, %v1061_v37  ;;  %v1216_v43 = vadd.f32 %v1215_v38, %v1214_v35  ;;  %v1446_v44 = vpop.f32.mrf.mxu0  ;;  %1031 = vst.msk [vmem:[%s2314_s4 + $0xd0] sm:$0xff] %vm1004_vm1, %v1933_v10 }
  0xd8   :  { %v1217_v46 = vsel %vm1004_vm1, %v1164_v41, 0.0  ;;  %1012 = vst.msk [vmem:[%s2314_s4 + $0x38] sm:$0xff] %vm1004_vm1, %v1446_v44  ;;  %v1167_v51 = vmul.f32 %v1446_v44, %v1446_v44  ;;  %v1068_v57 = vsel %vm1004_vm1, %v1446_v44, 0.0  ;;  %v1946_v17 = vpop.f32.mrf.mxu1 }
  0xd9   :  { %v1218_v47 = vadd.f32 %v1217_v46, %v1216_v43  ;;  %v785_v48 = vpop.f32.mrf.mxu0  ;;  %v1065_v49 = vadd.f32 %v1064_v45, %v1063_v42  ;;  %1034 = vst.msk [vmem:[%s2314_s4 + $0xe8] sm:$0xff] %vm1004_vm1, %v1946_v17 }
  0xda   :  { %1011 = vst.msk [vmem:[%s2314_s4 + $0x30] sm:$0xff] %vm1004_vm1, %v785_v48  ;;  %v1066_v52 = vsel %vm1004_vm1, %v785_v48, 0.0  ;;  %v1166_v53 = vmul.f32 %v785_v48, %v785_v48  ;;  %v1223_v62 = vsel %vm1004_vm1, %v1167_v51, 0.0  ;;  %v1959_v22 = vpop.f32.mrf.mxu1 }
  0xdb   :  { %v1067_v54 = vadd.f32 %v1066_v52, %v1065_v49  ;;  %v1220_v55 = vadd.f32 %v1219_v50, %v1218_v47  ;;  %v1449_v56 = vpop.f32.mrf.mxu0  ;;  %1033 = vst.msk [vmem:[%s2314_s4 + $0xe0] sm:$0xff] %vm1004_vm1, %v1959_v22 }
  0xdc   :  { %v1221_v58 = vsel %vm1004_vm1, %v1166_v53, 0.0  ;;  %1014 = vst.msk [vmem:[%s2314_s4 + $0x48] sm:$0xff] %vm1004_vm1, %v1449_v56  ;;  %v1169_v63 = vmul.f32 %v1449_v56, %v1449_v56  ;;  %v1072_v8 = vsel %vm1004_vm1, %v1449_v56, 0.0  ;;  %v1972_v30 = vpop.f32.mrf.mxu1 }
  0xdd   :  { %v1222_v59 = vadd.f32 %v1221_v58, %v1220_v55  ;;  %v795_v60 = vpop.f32.mrf.mxu0  ;;  %v1069_v61 = vadd.f32 %v1068_v57, %v1067_v54  ;;  %1036 = vst.msk [vmem:[%s2314_s4 + $0xf8] sm:$0xff] %vm1004_vm1, %v1972_v30 }
  0xde   :  { %1013 = vst.msk [vmem:[%s2314_s4 + $0x40] sm:$0xff] %vm1004_vm1, %v795_v60  ;;  %v1070_v0 = vsel %vm1004_vm1, %v795_v60, 0.0  ;;  %v1168_v1 = vmul.f32 %v795_v60, %v795_v60  ;;  %v1227_v14 = vsel %vm1004_vm1, %v1169_v63, 0.0  ;;  %v1985_v36 = vpop.f32.mrf.mxu1 }
  0xdf   :  { %v1071_v5 = vadd.f32 %v1070_v0, %v1069_v61  ;;  %v1224_v6 = vadd.f32 %v1223_v62, %v1222_v59  ;;  %v1452_v7 = vpop.f32.mrf.mxu0  ;;  %1035 = vst.msk [vmem:[%s2314_s4 + $0xf0] sm:$0xff] %vm1004_vm1, %v1985_v36 }
  0xe0   :  { %v1225_v9 = vsel %vm1004_vm1, %v1168_v1, 0.0  ;;  %1016 = vst.msk [vmem:[%s2314_s4 + $0x58] sm:$0xff] %vm1004_vm1, %v1452_v7  ;;  %v1171_v15 = vmul.f32 %v1452_v7, %v1452_v7  ;;  %v1076_v20 = vsel %vm1004_vm1, %v1452_v7, 0.0  ;;  %v1998_v44 = vpop.f32.mrf.mxu1 }
  0xe1   :  { %v1226_v11 = vadd.f32 %v1225_v9, %v1224_v6  ;;  %v805_v12 = vpop.f32.mrf.mxu0  ;;  %v1073_v13 = vadd.f32 %v1072_v8, %v1071_v5  ;;  %1038 = vst.msk [vmem:[%s2314_s4 + $0x108] sm:$0xff] %vm1004_vm1, %v1998_v44 }
  0xe2   :  { %1015 = vst.msk [vmem:[%s2314_s4 + $0x50] sm:$0xff] %vm1004_vm1, %v805_v12  ;;  %v1074_v16 = vsel %vm1004_vm1, %v805_v12, 0.0  ;;  %v1170_v3 = vmul.f32 %v805_v12, %v805_v12  ;;  %v1231_v26 = vsel %vm1004_vm1, %v1171_v15, 0.0  ;;  %v2011_v50 = vpop.f32.mrf.mxu1 }
  0xe3   :  { %v1075_v4 = vadd.f32 %v1074_v16, %v1073_v13  ;;  %v1228_v18 = vadd.f32 %v1227_v14, %v1226_v11  ;;  %v1455_v19 = vpop.f32.mrf.mxu0  ;;  %1037 = vst.msk [vmem:[%s2314_s4 + $0x100] sm:$0xff] %vm1004_vm1, %v2011_v50 }
  0xe4   :  { %v1229_v21 = vsel %vm1004_vm1, %v1170_v3, 0.0  ;;  %1018 = vst.msk [vmem:[%s2314_s4 + $0x68] sm:$0xff] %vm1004_vm1, %v1455_v19  ;;  %v1173_v27 = vmul.f32 %v1455_v19, %v1455_v19  ;;  %v1080_v34 = vsel %vm1004_vm1, %v1455_v19, 0.0  ;;  %v2024_v58 = vpop.f32.mrf.mxu1 }
  0xe5   :  { %v1230_v23 = vadd.f32 %v1229_v21, %v1228_v18  ;;  %v815_v24 = vpop.f32.mrf.mxu0  ;;  %v1077_v25 = vadd.f32 %v1076_v20, %v1075_v4  ;;  %1040 = vst.msk [vmem:[%s2314_s4 + $0x118] sm:$0xff] %vm1004_vm1, %v2024_v58 }
  0xe6   :  { %1017 = vst.msk [vmem:[%s2314_s4 + $0x60] sm:$0xff] %vm1004_vm1, %v815_v24  ;;  %v1078_v28 = vsel %vm1004_vm1, %v815_v24, 0.0  ;;  %v1172_v29 = vmul.f32 %v815_v24, %v815_v24  ;;  %v1235_v40 = vsel %vm1004_vm1, %v1173_v27, 0.0  ;;  %v2037_v0 = vpop.f32.mrf.mxu1 }
  0xe7   :  { %v1079_v31 = vadd.f32 %v1078_v28, %v1077_v25  ;;  %v1232_v32 = vadd.f32 %v1231_v26, %v1230_v23  ;;  %v1458_v33 = vpop.f32.mrf.mxu0  ;;  %1039 = vst.msk [vmem:[%s2314_s4 + $0x110] sm:$0xff] %vm1004_vm1, %v2037_v0 }
  0xe8   :  { %v1233_v35 = vsel %vm1004_vm1, %v1172_v29, 0.0  ;;  %1020 = vst.msk [vmem:[%s2314_s4 + $0x78] sm:$0xff] %vm1004_vm1, %v1458_v33  ;;  %v1175_v41 = vmul.f32 %v1458_v33, %v1458_v33  ;;  %v1084_v48 = vsel %vm1004_vm1, %v1458_v33, 0.0  ;;  %v2050_v12 = vpop.f32.mrf.mxu1 }
  0xe9   :  { %v1234_v37 = vadd.f32 %v1233_v35, %v1232_v32  ;;  %v825_v38 = vpop.f32.mrf.mxu0  ;;  %v1081_v39 = vadd.f32 %v1080_v34, %v1079_v31  ;;  %1042 = vst.msk [vmem:[%s2314_s4 + $0x128] sm:$0xff] %vm1004_vm1, %v2050_v12 }
  0xea   :  { %1019 = vst.msk [vmem:[%s2314_s4 + $0x70] sm:$0xff] %vm1004_vm1, %v825_v38  ;;  %v1082_v42 = vsel %vm1004_vm1, %v825_v38, 0.0  ;;  %v1174_v43 = vmul.f32 %v825_v38, %v825_v38  ;;  %v1239_v54 = vsel %vm1004_vm1, %v1175_v41, 0.0  ;;  %v2063_v4 = vpop.f32.mrf.mxu1 }
  0xeb   :  { %v1083_v45 = vadd.f32 %v1082_v42, %v1081_v39  ;;  %v1236_v46 = vadd.f32 %v1235_v40, %v1234_v37  ;;  %v1461_v47 = vpop.f32.mrf.mxu0  ;;  %1041 = vst.msk [vmem:[%s2314_s4 + $0x120] sm:$0xff] %vm1004_vm1, %v2063_v4 }
  0xec   :  { %v1237_v49 = vsel %vm1004_vm1, %v1174_v43, 0.0  ;;  %1022 = vst.msk [vmem:[%s2314_s4 + $0x88] sm:$0xff] %vm1004_vm1, %v1461_v47  ;;  %v1177_v55 = vmul.f32 %v1461_v47, %v1461_v47  ;;  %v1088_v62 = vsel %vm1004_vm1, %v1461_v47, 0.0  ;;  %v2076_v26 = vpop.f32.mrf.mxu1 }
  0xed   :  { %v1238_v51 = vadd.f32 %v1237_v49, %v1236_v46  ;;  %v835_v52 = vpop.f32.mrf.mxu0  ;;  %v1085_v53 = vadd.f32 %v1084_v48, %v1083_v45  ;;  %1044 = vst.msk [vmem:[%s2314_s4 + $0x138] sm:$0xff] %vm1004_vm1, %v2076_v26 }
  0xee   :  { %1021 = vst.msk [vmem:[%s2314_s4 + $0x80] sm:$0xff] %vm1004_vm1, %v835_v52  ;;  %v1086_v56 = vsel %vm1004_vm1, %v835_v52, 0.0  ;;  %v1176_v57 = vmul.f32 %v835_v52, %v835_v52  ;;  %v1243_v7 = vsel %vm1004_vm1, %v1177_v55, 0.0  ;;  %v2089_v33 = vpop.f32.mrf.mxu1 }
  0xef   :  { %v1087_v59 = vadd.f32 %v1086_v56, %v1085_v53  ;;  %v1240_v60 = vadd.f32 %v1239_v54, %v1238_v51  ;;  %v1464_v61 = vpop.f32.mrf.mxu0  ;;  %1043 = vst.msk [vmem:[%s2314_s4 + $0x130] sm:$0xff] %vm1004_vm1, %v2089_v33 }
  0xf0   :  { %v1241_v63 = vsel %vm1004_vm1, %v1176_v57, 0.0  ;;  %1024 = vst.msk [vmem:[%s2314_s4 + $0x98] sm:$0xff] %vm1004_vm1, %v1464_v61  ;;  %v1179_v8 = vmul.f32 %v1464_v61, %v1464_v61  ;;  %v1092_v16 = vsel %vm1004_vm1, %v1464_v61, 0.0  ;;  %v2102_v42 = vpop.f32.mrf.mxu1 }
  0xf1   :  { %v1242_v1 = vadd.f32 %v1241_v63, %v1240_v60  ;;  %v845_v5 = vpop.f32.mrf.mxu0  ;;  %v1089_v6 = vadd.f32 %v1088_v62, %v1087_v59  ;;  %1046 = vst.msk [vmem:[%s2314_s4 + $0x148] sm:$0xff] %vm1004_vm1, %v2102_v42 }
  0xf2   :  { %1023 = vst.msk [vmem:[%s2314_s4 + $0x90] sm:$0xff] %vm1004_vm1, %v845_v5  ;;  %v1090_v9 = vsel %vm1004_vm1, %v845_v5, 0.0  ;;  %v1178_v11 = vmul.f32 %v845_v5, %v845_v5  ;;  %v1247_v21 = vsel %vm1004_vm1, %v1179_v8, 0.0  ;;  %v2115_v49 = vpop.f32.mrf.mxu1 }
  0xf3   :  { %v1091_v13 = vadd.f32 %v1090_v9, %v1089_v6  ;;  %v1244_v14 = vadd.f32 %v1243_v7, %v1242_v1  ;;  %v1467_v15 = vpop.f32.mrf.mxu0  ;;  %1045 = vst.msk [vmem:[%s2314_s4 + $0x140] sm:$0xff] %vm1004_vm1, %v2115_v49  ;;  %v1186_v1 = vmul.f32 %v1933_v10, %v1933_v10  ;;  %v1187_v9 = vmul.f32 %v1920_v2, %v1920_v2 }
  0xf4   :  { %v1245_v3 = vsel %vm1004_vm1, %v1178_v11, 0.0  ;;  %1026 = vst.msk [vmem:[%s2314_s4 + $0xa8] sm:$0xff] %vm1004_vm1, %v1467_v15  ;;  %v1181_v23 = vmul.f32 %v1467_v15, %v1467_v15  ;;  %v1096_v31 = vsel %vm1004_vm1, %v1467_v15, 0.0  ;;  %v2128_v59 = vpop.f32.mrf.mxu1  ;;  %v1106_v11 = vsel %vm1004_vm1, %v1933_v10, 0.0 }
  0xf5   :  { %v1246_v18 = vadd.f32 %v1245_v3, %v1244_v14  ;;  %v855_v19 = vpop.f32.mrf.mxu0  ;;  %v1093_v20 = vadd.f32 %v1092_v16, %v1091_v13  ;;  %1048 = vst.msk [vmem:[%s2314_s4 + $0x158] sm:$0xff] %vm1004_vm1, %v2128_v59  ;;  %v1108_v16 = vsel %vm1004_vm1, %v1920_v2, 0.0  ;;  %v1261_v3 = vsel %vm1004_vm1, %v1186_v1, 0.0 }
  0xf6   :  { %1025 = vst.msk [vmem:[%s2314_s4 + $0xa0] sm:$0xff] %vm1004_vm1, %v855_v19  ;;  %v1094_v24 = vsel %vm1004_vm1, %v855_v19, 0.0  ;;  %v1180_v25 = vmul.f32 %v855_v19, %v855_v19  ;;  %v1251_v38 = vsel %vm1004_vm1, %v1181_v23, 0.0  ;;  %v2139_v5 = vpop.f32.mrf.mxu1  ;;  %v1189_v2 = vmul.f32 %v1946_v17, %v1946_v17 }
  0xf7   :  { %v1095_v27 = vadd.f32 %v1094_v24, %v1093_v20  ;;  %v1248_v28 = vadd.f32 %v1247_v21, %v1246_v18  ;;  %v1470_v29 = vpop.f32.mrf.mxu0  ;;  %1047 = vst.msk [vmem:[%s2314_s4 + $0x150] sm:$0xff] %vm1004_vm1, %v2139_v5  ;;  %v1188_v18 = vmul.f32 %v1959_v22, %v1959_v22  ;;  %v1263_v21 = vsel %vm1004_vm1, %v1187_v9, 0.0 }
  0xf8   :  { %v1249_v32 = vsel %vm1004_vm1, %v1180_v25, 0.0  ;;  %1028 = vst.msk [vmem:[%s2314_s4 + $0xb8] sm:$0xff] %vm1004_vm1, %v1470_v29  ;;  %v1183_v39 = vmul.f32 %v1470_v29, %v1470_v29  ;;  %v1100_v47 = vsel %vm1004_vm1, %v1470_v29, 0.0  ;;  %v2151_v13 = vpop.f32.mrf.mxu1  ;;  %v1110_v23 = vsel %vm1004_vm1, %v1959_v22, 0.0 }
  0xf9   :  { %v1250_v34 = vadd.f32 %v1249_v32, %v1248_v28  ;;  %v865_v35 = vpop.f32.mrf.mxu0  ;;  %v1097_v37 = vadd.f32 %v1096_v31, %v1095_v27  ;;  %1050 = vst.msk [vmem:[%s2314_s4 + $0x168] sm:$0xff] %vm1004_vm1, %v2151_v13  ;;  %v1112_v28 = vsel %vm1004_vm1, %v1946_v17, 0.0  ;;  %v1265_v29 = vsel %vm1004_vm1, %v1188_v18, 0.0 }
  0xfa   :  { %1027 = vst.msk [vmem:[%s2314_s4 + $0xb0] sm:$0xff] %vm1004_vm1, %v865_v35  ;;  %v1098_v40 = vsel %vm1004_vm1, %v865_v35, 0.0  ;;  %v1182_v41 = vmul.f32 %v865_v35, %v865_v35  ;;  %v1255_v54 = vsel %vm1004_vm1, %v1183_v39, 0.0  ;;  %v2163_v19 = vpop.f32.mrf.mxu1  ;;  %v1190_v31 = vmul.f32 %v1985_v36, %v1985_v36 }
  0xfb   :  { %v1099_v43 = vadd.f32 %v1098_v40, %v1097_v37  ;;  %v1252_v45 = vadd.f32 %v1251_v38, %v1250_v34  ;;  %v1473_v46 = vpop.f32.mrf.mxu0  ;;  %1049 = vst.msk [vmem:[%s2314_s4 + $0x160] sm:$0xff] %vm1004_vm1, %v2163_v19  ;;  %v1267_v35 = vsel %vm1004_vm1, %v1189_v2, 0.0  ;;  %v1191_v17 = vmul.f32 %v1972_v30, %v1972_v30 }
  0xfc   :  { %v1253_v48 = vsel %vm1004_vm1, %v1182_v41, 0.0  ;;  %1030 = vst.msk [vmem:[%s2314_s4 + $0xc8] sm:$0xff] %vm1004_vm1, %v1473_v46  ;;  %v1185_v55 = vmul.f32 %v1473_v46, %v1473_v46  ;;  %v1104_v62 = vsel %vm1004_vm1, %v1473_v46, 0.0  ;;  %v2175_v24 = vpop.f32.mrf.mxu1  ;;  %v1114_v37 = vsel %vm1004_vm1, %v1985_v36, 0.0 }
  0xfd   :  { %v1254_v51 = vadd.f32 %v1253_v48, %v1252_v45  ;;  %v875_v52 = vpop.f32.mrf.mxu0  ;;  %v1101_v53 = vadd.f32 %v1100_v47, %v1099_v43  ;;  %1052 = vst.msk [vmem:[%s2314_s4 + $0x178] sm:$0xff] %vm1004_vm1, %v2175_v24  ;;  %v1116_v41 = vsel %vm1004_vm1, %v1972_v30, 0.0  ;;  %v1269_v43 = vsel %vm1004_vm1, %v1190_v31, 0.0 }
  0xfe   :  { %1029 = vst.msk [vmem:[%s2314_s4 + $0xc0] sm:$0xff] %vm1004_vm1, %v875_v52  ;;  %v1102_v56 = vsel %vm1004_vm1, %v875_v52, 0.0  ;;  %v1184_v57 = vmul.f32 %v875_v52, %v875_v52  ;;  %v1259_v8 = vsel %vm1004_vm1, %v1185_v55, 0.0  ;;  %v2187_v32 = vpop.f32.mrf.mxu1  ;;  %v1192_v45 = vmul.f32 %v2011_v50, %v2011_v50 }
  0xff   :  { %v1103_v60 = vadd.f32 %v1102_v56, %v1101_v53  ;;  %v1256_v61 = vadd.f32 %v1255_v54, %v1254_v51  ;;  %1051 = vst.msk [vmem:[%s2314_s4 + $0x170] sm:$0xff] %vm1004_vm1, %v2187_v32  ;;  %v1271_v48 = vsel %vm1004_vm1, %v1191_v17, 0.0  ;;  %v1193_v30 = vmul.f32 %v1998_v44, %v1998_v44 }
 0x100   :  { %v1257_v63 = vsel %vm1004_vm1, %v1184_v57, 0.0  ;;  %v2199_v38 = vpop.f32.mrf.mxu1  ;;  %v1118_v51 = vsel %vm1004_vm1, %v2011_v50, 0.0  ;;  %v1120_v54 = vsel %vm1004_vm1, %v1998_v44, 0.0  ;;  %v1273_v55 = vsel %vm1004_vm1, %v1192_v45, 0.0 }
 0x101   :  { %v1105_v6 = vadd.f32 %v1104_v62, %v1103_v60  ;;  %v1258_v7 = vadd.f32 %v1257_v63, %v1256_v61  ;;  %1054 = vst.msk [vmem:[%s2314_s4 + $0x188] sm:$0xff] %vm1004_vm1, %v2199_v38  ;;  %v1194_v56 = vmul.f32 %v2037_v0, %v2037_v0  ;;  %v1275_v61 = vsel %vm1004_vm1, %v1193_v30, 0.0 }
 0x102   :  { %v2211_v46 = vpop.f32.mrf.mxu1  ;;  %v1195_v62 = vmul.f32 %v2024_v58, %v2024_v58  ;;  %v1122_v50 = vsel %vm1004_vm1, %v2037_v0, 0.0  ;;  %v1124_v44 = vsel %vm1004_vm1, %v2024_v58, 0.0  ;;  %v1126_v0 = vsel %vm1004_vm1, %v2063_v4, 0.0 }
 0x103   :  { %v1260_v14 = vadd.f32 %v1259_v8, %v1258_v7  ;;  %v1107_v15 = vadd.f32 %v1106_v11, %v1105_v6  ;;  %1053 = vst.msk [vmem:[%s2314_s4 + $0x180] sm:$0xff] %vm1004_vm1, %v2211_v46  ;;  %v1277_v6 = vsel %vm1004_vm1, %v1194_v56, 0.0  ;;  %v1196_v7 = vmul.f32 %v2063_v4, %v2063_v4 }
 0x104   :  { %v1279_v11 = vsel %vm1004_vm1, %v1195_v62, 0.0  ;;  %v1128_v58 = vsel %vm1004_vm1, %v2050_v12, 0.0  ;;  %v1198_v18 = vmul.f32 %v2089_v33, %v2089_v33  ;;  %v1199_v2 = vmul.f32 %v2076_v26, %v2076_v26 }
 0x105   :  { %v1262_v10 = vadd.f32 %v1261_v3, %v1260_v14  ;;  %v1109_v20 = vadd.f32 %v1108_v16, %v1107_v15  ;;  %v1197_v14 = vmul.f32 %v2050_v12, %v2050_v12  ;;  %v1281_v3 = vsel %vm1004_vm1, %v1196_v7, 0.0 }
 0x106   :  { %v1130_v4 = vsel %vm1004_vm1, %v2089_v33, 0.0  ;;  %v1132_v12 = vsel %vm1004_vm1, %v2076_v26, 0.0  ;;  %v1134_v33 = vsel %vm1004_vm1, %v2115_v49, 0.0  ;;  %v1136_v26 = vsel %vm1004_vm1, %v2102_v42, 0.0 }
 0x107   :  { %v1111_v25 = vadd.f32 %v1110_v23, %v1109_v20  ;;  %v1264_v27 = vadd.f32 %v1263_v21, %v1262_v10  ;;  %v1283_v21 = vsel %vm1004_vm1, %v1197_v14, 0.0  ;;  %v1203_v45 = vmul.f32 %v2128_v59, %v2128_v59 }
 0x108   :  { %v1204_v30 = vmul.f32 %v2163_v19, %v2163_v19  ;;  %v1208_v7 = vmul.f32 %v2211_v46, %v2211_v46  ;;  %v1209_v14 = vmul.f32 %v2199_v38, %v2199_v38 }
 0x109   :  { %v1266_v22 = vadd.f32 %v1265_v29, %v1264_v27  ;;  %v1113_v34 = vadd.f32 %v1112_v28, %v1111_v25  ;;  %v1285_v27 = vsel %vm1004_vm1, %v1198_v18, 0.0  ;;  %v1200_v28 = vmul.f32 %v2115_v49, %v2115_v49 }
 0x10a   :  { %v1138_v49 = vsel %vm1004_vm1, %v2139_v5, 0.0  ;;  %v1307_v18 = vsel %vm1004_vm1, %v1209_v14, 0.0 }
 0x10b   :  { %v1115_v39 = vadd.f32 %v1114_v37, %v1113_v34  ;;  %v1268_v40 = vadd.f32 %v1267_v35, %v1266_v22  ;;  %v1287_v22 = vsel %vm1004_vm1, %v1199_v2, 0.0  ;;  %v1201_v34 = vmul.f32 %v2102_v42, %v2102_v42 }
 0x10c   :  { %v1289_v37 = vsel %vm1004_vm1, %v1200_v28, 0.0  ;;  %v1140_v42 = vsel %vm1004_vm1, %v2128_v59, 0.0  ;;  %v1144_v59 = vsel %vm1004_vm1, %v2151_v13, 0.0 }
 0x10d   :  { %v1270_v36 = vadd.f32 %v1269_v43, %v1268_v40  ;;  %v1117_v47 = vadd.f32 %v1116_v41, %v1115_v39  ;;  %v1202_v39 = vmul.f32 %v2139_v5, %v2139_v5  ;;  %v1291_v43 = vsel %vm1004_vm1, %v1201_v34, 0.0 }
 0x10e   :  { %v1142_v5 = vsel %vm1004_vm1, %v2163_v19, 0.0  ;;  %v1146_v19 = vsel %vm1004_vm1, %v2187_v32, 0.0 }
 0x10f   :  { %v1119_v52 = vadd.f32 %v1118_v51, %v1117_v47  ;;  %v1272_v53 = vadd.f32 %v1271_v48, %v1270_v36  ;;  %v1293_v48 = vsel %vm1004_vm1, %v1202_v39, 0.0 }
 0x111   :  { %v1274_v57 = vadd.f32 %v1273_v55, %v1272_v53  ;;  %v1121_v60 = vadd.f32 %v1120_v54, %v1119_v52  ;;  %v1295_v53 = vsel %vm1004_vm1, %v1203_v45, 0.0  ;;  %v1205_v54 = vmul.f32 %v2151_v13, %v2151_v13 }
 0x112   :  { %v1148_v13 = vsel %vm1004_vm1, %v2175_v24, 0.0 }
 0x113   :  { %v1123_v63 = vadd.f32 %v1122_v50, %v1121_v60  ;;  %v1276_v1 = vadd.f32 %v1275_v61, %v1274_v57  ;;  %v1297_v57 = vsel %vm1004_vm1, %v1204_v30, 0.0  ;;  %v1206_v60 = vmul.f32 %v2187_v32, %v2187_v32 }
 0x114   :  { %v1299_v50 = vsel %vm1004_vm1, %v1205_v54, 0.0  ;;  %v1150_v32 = vsel %vm1004_vm1, %v2211_v46, 0.0 }
 0x115   :  { %v1278_v8 = vadd.f32 %v1277_v6, %v1276_v1  ;;  %v1125_v9 = vadd.f32 %v1124_v44, %v1123_v63  ;;  %v1207_v63 = vmul.f32 %v2175_v24, %v2175_v24  ;;  %v1301_v6 = vsel %vm1004_vm1, %v1206_v60, 0.0 }
 0x116   :  { %v1152_v24 = vsel %vm1004_vm1, %v2199_v38, 0.0 }
 0x117   :  { %v1127_v15 = vadd.f32 %v1126_v0, %v1125_v9  ;;  %v1280_v16 = vadd.f32 %v1279_v11, %v1278_v8  ;;  %v1303_v11 = vsel %vm1004_vm1, %v1207_v63, 0.0 }
 0x119   :  { %v1282_v10 = vadd.f32 %v1281_v3, %v1280_v16  ;;  %v1129_v20 = vadd.f32 %v1128_v58, %v1127_v15  ;;  %v1305_v16 = vsel %vm1004_vm1, %v1208_v7, 0.0 }
 0x11b   :  { %v1131_v23 = vadd.f32 %v1130_v4, %v1129_v20  ;;  %v1284_v25 = vadd.f32 %v1283_v21, %v1282_v10 }
 0x11d   :  { %v1286_v29 = vadd.f32 %v1285_v27, %v1284_v25  ;;  %v1133_v31 = vadd.f32 %v1132_v12, %v1131_v23 }
 0x11f   :  { %v1135_v35 = vadd.f32 %v1134_v33, %v1133_v31  ;;  %v1288_v17 = vadd.f32 %v1287_v22, %v1286_v29 }
 0x121   :  { %v1290_v40 = vadd.f32 %v1289_v37, %v1288_v17  ;;  %v1137_v41 = vadd.f32 %v1136_v26, %v1135_v35 }
 0x123   :  { %v1139_v36 = vadd.f32 %v1138_v49, %v1137_v41  ;;  %v1292_v47 = vadd.f32 %v1291_v43, %v1290_v40 }
 0x125   :  { %v1294_v51 = vadd.f32 %v1293_v48, %v1292_v47  ;;  %v1141_v52 = vadd.f32 %v1140_v42, %v1139_v36 }
 0x127   :  { %v1143_v55 = vadd.f32 %v1142_v5, %v1141_v52  ;;  %v1296_v56 = vadd.f32 %v1295_v53, %v1294_v51 }
 0x129   :  { %v1298_v61 = vadd.f32 %v1297_v57, %v1296_v56  ;;  %v1145_v62 = vadd.f32 %v1144_v59, %v1143_v55 }
 0x12b   :  { %v1147_v1 = vadd.f32 %v1146_v19, %v1145_v62  ;;  %v1300_v44 = vadd.f32 %v1299_v50, %v1298_v61 }
 0x12d   :  { %v1302_v8 = vadd.f32 %v1301_v6, %v1300_v44  ;;  %v1149_v9 = vadd.f32 %v1148_v13, %v1147_v1 }
 0x12f   :  { %v1151_v0 = vadd.f32 %v1150_v32, %v1149_v9  ;;  %v1304_v15 = vadd.f32 %v1303_v11, %v1302_v8 }
 0x131   :  { %v1153_v58 = vadd.f32 %v1152_v24, %v1151_v0  ;;  %v1306_v3 = vadd.f32 %v1305_v16, %v1304_v15 }
 0x133   :  { %v1154_v10 = vrot.slane %v1153_v58, 4  ;;  %v1308_v20 = vadd.f32 %v1307_v18, %v1306_v3 }
 0x135   :  { %v1155_v21 = vadd.f32 %v1154_v10, %v1153_v58  ;;  %v1309_v2 = vrot.slane %v1308_v20, 4 }
 0x137   :  { %v1156_v4 = vrot.slane %v1155_v21, 2  ;;  %v1310_v23 = vadd.f32 %v1309_v2, %v1308_v20 }
 0x139   :  { %v1157_v25 = vadd.f32 %v1156_v4, %v1155_v21  ;;  %v1311_v12 = vrot.slane %v1310_v23, 2 }
 0x13b   :  { %v1158_v46 = vrot.slane %v1157_v25, 1  ;;  %v1312_v27 = vadd.f32 %v1311_v12, %v1310_v23 }
 0x13d   :  { %v1313_v28 = vrot.slane %v1312_v27, 1  ;;  %v1159_v29 = vadd.f32 %v1158_v46, %v1157_v25 }
 0x13f   :  { %v1314_v38 = vadd.f32 %v1313_v28, %v1312_v27 }
 0x141   :  { %v1316_v31 = vsel %vm1315_vm2, %v1159_v29, %v1314_v38 }
 0x142   :  { %1318 = vst.msk [vmem:[%s2315_s5] sm:$0x3] %vm1317_vm3, %v1316_v31 }

// kernel: generator_forward.9
= control target key start
LH: loop header
LB: loop body
LE: loop exit
PB: predicated region body
PF: predicated region fallthrough
CT: control target
= control target key end

     0   :  { %vm245_vm0 = vcmask 261120   ;;  %vm761_vm1 = vcmask 130048   ;;  %s1721_s3 = inlined_call_operand.vmem [shape: f32[32,16], index: 3, kind: input, shape index: {}]   ;;  %s1722_s0 = inlined_call_operand.vmem [shape: f32[400,32], index: 0, kind: input, shape index: {}]   ;;  %s1723_s1 = inlined_call_operand.vmem [shape: f32[1,32], index: 1, kind: input, shape index: {}]   ;;  %s1724_s2 = inlined_call_operand.vmem [shape: f32[1,32], index: 2, kind: input, shape index: {}]   ;;  %s1725_s4 = inlined_call_operand.vmem [shape: f32[1,16], index: 4, kind: input, shape index: {}]   ;;  %s1726_s5 = inlined_call_operand.vmem [shape: f32[400,16], index: 5, kind: output, shape index: {}]  }
   0x1   :  { %v237_v0 = vld [vmem:[%s1721_s3 + $0x18] sm:$0xff]  ;;  %v236_v1 = vld [vmem:[%s1721_s3 + $0x10] sm:$0xff]  ;;  %v235_v2 = vld [vmem:[%s1721_s3 + $0x8] sm:$0xff] }
   0x2   :  { %923 = vmatprep.subr.mxu0 %v237_v0  ;;  %1006 = vmatprep.subr.mxu1 %v237_v0  ;;  %v20_v3 = vld [vmem:[%s1722_s0] sm:$0xff]  ;;  %v21_v7 = vld [vmem:[%s1722_s0 + $0x8] sm:$0xff]  ;;  %v46_v8 = vld [vmem:[%s1722_s0 + $0xd0] sm:$0xff] }
   0x3   :  { %v1159_v4 = vld [vmem:[%s1723_s1] ss:$0 sm:$0xff]  ;;  %924 = vmatpush3.msra.mxu0 %v237_v0  ;;  %1010 = vmatpush3.msra.mxu1 %v237_v0  ;;  %v47_v11 = vld [vmem:[%s1722_s0 + $0xd8] sm:$0xff]  ;;  %v22_v12 = vld [vmem:[%s1722_s0 + $0x10] sm:$0xff] }
   0x4   :  { %v77_v5 = vmul.f32 %v1159_v4, %v20_v3  ;;  %v1165_v6 = vld [vmem:[%s1724_s2] ss:$0 sm:$0xff]  ;;  %925 = vmatprep.subr.mxu0 %v236_v1  ;;  %1007 = vmatprep.subr.mxu1 %v236_v1  ;;  %v78_v9 = vmul.f32 %v1159_v4, %v21_v7  ;;  %v103_v10 = vmul.f32 %v1159_v4, %v46_v8  ;;  %v23_v13 = vld [vmem:[%s1722_s0 + $0x18] sm:$0xff]  ;;  %v49_v19 = vld [vmem:[%s1722_s0 + $0xe8] sm:$0xff] }
   0x5   :  { %926 = vmatpush3.msra.mxu0 %v236_v1  ;;  %1011 = vmatpush3.msra.mxu1 %v236_v1  ;;  %v234_v14 = vld [vmem:[%s1721_s3] sm:$0xff]  ;;  %v104_v16 = vmul.f32 %v1159_v4, %v47_v11  ;;  %v79_v17 = vmul.f32 %v1159_v4, %v22_v12  ;;  %v80_v22 = vmul.f32 %v1159_v4, %v23_v13  ;;  %v25_v28 = vld [vmem:[%s1722_s0 + $0x28] sm:$0xff]  ;;  %v50_v29 = vld [vmem:[%s1722_s0 + $0xf0] sm:$0xff] }
   0x6   :  { %v134_v15 = vadd.f32 %v1165_v6, %v77_v5  ;;  %v48_v18 = vld [vmem:[%s1722_s0 + $0xe0] sm:$0xff]  ;;  %927 = vmatprep.subr.mxu0 %v235_v2  ;;  %1008 = vmatprep.subr.mxu1 %v235_v2  ;;  %v135_v20 = vadd.f32 %v1165_v6, %v78_v9  ;;  %v160_v21 = vadd.f32 %v1165_v6, %v103_v10  ;;  %v51_v34 = vld [vmem:[%s1722_s0 + $0xf8] sm:$0xff]  ;;  %v26_v35 = vld [vmem:[%s1722_s0 + $0x30] sm:$0xff] }
   0x7   :  { %v24_v23 = vld [vmem:[%s1722_s0 + $0x20] sm:$0xff]  ;;  %928 = vmatpush3.msra.mxu0 %v235_v2  ;;  %1012 = vmatpush3.msra.mxu1 %v235_v2  ;;  %v161_v25 = vadd.f32 %v1165_v6, %v104_v16  ;;  %v136_v26 = vadd.f32 %v1165_v6, %v79_v17  ;;  %v105_v27 = vmul.f32 %v1159_v4, %v48_v18  ;;  %v27_v40 = vld [vmem:[%s1722_s0 + $0x38] sm:$0xff]  ;;  %v53_v50 = vld [vmem:[%s1722_s0 + $0x108] sm:$0xff] }
   0x8   :  { %v184_v24 = vmax.f32 %v134_v15, 0.0  ;;  %929 = vmatprep.subr.mxu0 %v234_v14  ;;  %1009 = vmatprep.subr.mxu1 %v234_v14  ;;  %v185_v30 = vmax.f32 %v135_v20, 0.0  ;;  %v210_v31 = vmax.f32 %v160_v21, 0.0  ;;  %v137_v32 = vadd.f32 %v1165_v6, %v80_v22  ;;  %v52_v45 = vld [vmem:[%s1722_s0 + $0x100] sm:$0xff]  ;;  %v29_v60 = vld [vmem:[%s1722_s0 + $0x48] sm:$0xff]  ;;  %v54_v61 = vld [vmem:[%s1722_s0 + $0x110] sm:$0xff] }
   0x9   :  { %v106_v33 = vmul.f32 %v1159_v4, %v49_v19  ;;  %930 = vmatpush3.msra.mxu0 %v234_v14  ;;  %v211_v36 = vmax.f32 %v161_v25, 0.0  ;;  %v186_v37 = vmax.f32 %v136_v26, 0.0  ;;  %v162_v38 = vadd.f32 %v1165_v6, %v105_v27  ;;  %1013 = vmatpush3.msra.mxu1 %v234_v14  ;;  %v28_v55 = vld [vmem:[%s1722_s0 + $0x40] sm:$0xff]  ;;  %v55_v2 = vld [vmem:[%s1722_s0 + $0x118] sm:$0xff]  ;;  %v30_v3 = vld [vmem:[%s1722_s0 + $0x50] sm:$0xff] }
   0xa   :  { %931 = vmatprep.mubr.msk.f32.mxu0 %vm245_vm0, %v184_v24  ;;  %v81_v39 = vmul.f32 %v1159_v4, %v24_v23  ;;  %v187_v41 = vmax.f32 %v137_v32, 0.0  ;;  %v82_v43 = vmul.f32 %v1159_v4, %v25_v28  ;;  %v107_v44 = vmul.f32 %v1159_v4, %v50_v29  ;;  %970 = vmatprep.mubr.msk.f32.mxu1 %vm245_vm0, %v210_v31  ;;  %v31_v9 = vld [vmem:[%s1722_s0 + $0x58] sm:$0xff]  ;;  %v56_v14 = vld [vmem:[%s1722_s0 + $0x120] sm:$0xff]  ;;  %v57_v19 = vld [vmem:[%s1722_s0 + $0x128] sm:$0xff] }
   0xb   :  { %932 = vmatmul.mubr.msk.f32.vlgmr.msra.gmra.mxu0 %vm245_vm0, %v185_v30  ;;  %v163_v42 = vadd.f32 %v1165_v6, %v106_v33  ;;  %v212_v46 = vmax.f32 %v162_v38, 0.0  ;;  %v108_v48 = vmul.f32 %v1159_v4, %v51_v34  ;;  %v83_v49 = vmul.f32 %v1159_v4, %v26_v35  ;;  %971 = vmatmul.mubr.msk.f32.vlgmr.msra.gmra.mxu1 %vm245_vm0, %v211_v36  ;;  %v32_v24 = vld [vmem:[%s1722_s0 + $0x60] sm:$0xff]  ;;  %v33_v28 = vld [vmem:[%s1722_s0 + $0x68] sm:$0xff]  ;;  %v58_v29 = vld [vmem:[%s1722_s0 + $0x130] sm:$0xff] }
   0xc   :  { %934 = vmatprep.mubr.msk.f32.mxu0 %vm245_vm0, %v186_v37  ;;  %v138_v47 = vadd.f32 %v1165_v6, %v81_v39  ;;  %v139_v52 = vadd.f32 %v1165_v6, %v82_v43  ;;  %v164_v53 = vadd.f32 %v1165_v6, %v107_v44  ;;  %v84_v54 = vmul.f32 %v1159_v4, %v27_v40  ;;  %v34_v33 = vld [vmem:[%s1722_s0 + $0x70] sm:$0xff]  ;;  %v59_v37 = vld [vmem:[%s1722_s0 + $0x138] sm:$0xff] }
   0xd   :  { %v213_v51 = vmax.f32 %v163_v42, 0.0  ;;  %973 = vmatprep.mubr.msk.f32.mxu1 %vm245_vm0, %v212_v46  ;;  %v165_v57 = vadd.f32 %v1165_v6, %v108_v48  ;;  %v140_v58 = vadd.f32 %v1165_v6, %v83_v49  ;;  %v109_v59 = vmul.f32 %v1159_v4, %v52_v45  ;;  %v60_v42 = vld [vmem:[%s1722_s0 + $0x140] sm:$0xff]  ;;  %v35_v46 = vld [vmem:[%s1722_s0 + $0x78] sm:$0xff] }
   0xe   :  { %v188_v56 = vmax.f32 %v138_v47, 0.0  ;;  %v189_v62 = vmax.f32 %v139_v52, 0.0  ;;  %v214_v63 = vmax.f32 %v164_v53, 0.0  ;;  %v141_v0 = vadd.f32 %v1165_v6, %v84_v54  ;;  %v61_v54 = vld [vmem:[%s1722_s0 + $0x148] sm:$0xff] }
   0xf   :  { %935 = vmatmul.mubr.msk.f32.gmra.mxu0 %vm245_vm0, %v187_v41  ;;  %v110_v1 = vmul.f32 %v1159_v4, %v53_v50  ;;  %v190_v5 = vmax.f32 %v140_v58, 0.0  ;;  %v166_v7 = vadd.f32 %v1165_v6, %v109_v59  ;;  %v85_v8 = vmul.f32 %v1159_v4, %v28_v55  ;;  %974 = vmatmul.mubr.msk.f32.gmra.mxu1 %vm245_vm0, %v213_v51  ;;  %v36_v50 = vld [vmem:[%s1722_s0 + $0x80] sm:$0xff]  ;;  %v62_v58 = vld [vmem:[%s1722_s0 + $0x150] sm:$0xff] }
  0x10   :  { %937 = vmatprep.mubr.msk.f32.mxu0 %vm245_vm0, %v188_v56  ;;  %v215_v10 = vmax.f32 %v165_v57, 0.0  ;;  %v86_v12 = vmul.f32 %v1159_v4, %v29_v60  ;;  %v111_v13 = vmul.f32 %v1159_v4, %v54_v61  ;;  %976 = vmatprep.mubr.msk.f32.mxu1 %vm245_vm0, %v214_v63  ;;  %v112_v17 = vmul.f32 %v1159_v4, %v55_v2  ;;  %v38_v2 = vld [vmem:[%s1722_s0 + $0x90] sm:$0xff] }
  0x11   :  { %v167_v11 = vadd.f32 %v1165_v6, %v110_v1  ;;  %v216_v15 = vmax.f32 %v166_v7, 0.0  ;;  %v142_v16 = vadd.f32 %v1165_v6, %v85_v8  ;;  %v87_v18 = vmul.f32 %v1159_v4, %v30_v3  ;;  %v63_v8 = vld [vmem:[%s1722_s0 + $0x158] sm:$0xff] }
  0x12   :  { %v191_v20 = vmax.f32 %v141_v0, 0.0  ;;  %v143_v21 = vadd.f32 %v1165_v6, %v86_v12  ;;  %v168_v22 = vadd.f32 %v1165_v6, %v111_v13  ;;  %v88_v23 = vmul.f32 %v1159_v4, %v31_v9  ;;  %v64_v12 = vld [vmem:[%s1722_s0 + $0x160] sm:$0xff] }
  0x13   :  { %938 = vmatmul.mubr.msk.f32.gmra.mxu0 %vm245_vm0, %v189_v62  ;;  %v192_v25 = vmax.f32 %v142_v16, 0.0  ;;  %v144_v26 = vadd.f32 %v1165_v6, %v87_v18  ;;  %v113_v27 = vmul.f32 %v1159_v4, %v56_v14  ;;  %977 = vmatmul.mubr.msk.f32.gmra.mxu1 %vm245_vm0, %v215_v10  ;;  %v217_v30 = vmax.f32 %v167_v11, 0.0  ;;  %v37_v62 = vld [vmem:[%s1722_s0 + $0x88] sm:$0xff]  ;;  %v39_v16 = vld [vmem:[%s1722_s0 + $0x98] sm:$0xff] }
  0x14   :  { %940 = vmatprep.mubr.msk.f32.mxu0 %vm245_vm0, %v190_v5  ;;  %v169_v31 = vadd.f32 %v1165_v6, %v112_v17  ;;  %v114_v32 = vmul.f32 %v1159_v4, %v57_v19  ;;  %979 = vmatprep.mubr.msk.f32.mxu1 %vm245_vm0, %v216_v15  ;;  %v218_v34 = vmax.f32 %v168_v22, 0.0  ;;  %v89_v36 = vmul.f32 %v1159_v4, %v32_v24  ;;  %v65_v24 = vld [vmem:[%s1722_s0 + $0x168] sm:$0xff] }
  0x15   :  { %v170_v35 = vadd.f32 %v1165_v6, %v113_v27  ;;  %v193_v38 = vmax.f32 %v143_v21, 0.0  ;;  %v145_v39 = vadd.f32 %v1165_v6, %v88_v23  ;;  %v90_v40 = vmul.f32 %v1159_v4, %v33_v28  ;;  %v66_v28 = vld [vmem:[%s1722_s0 + $0x170] sm:$0xff] }
  0x16   :  { %v115_v41 = vmul.f32 %v1159_v4, %v58_v29  ;;  %v194_v43 = vmax.f32 %v144_v26, 0.0  ;;  %v146_v44 = vadd.f32 %v1165_v6, %v89_v36  ;;  %v91_v45 = vmul.f32 %v1159_v4, %v34_v33  ;;  %v42_v36 = vld [vmem:[%s1722_s0 + $0xb0] sm:$0xff] }
  0x17   :  { %941 = vmatmul.mubr.msk.f32.gmra.mxu0 %vm245_vm0, %v191_v20  ;;  %980 = vmatmul.mubr.msk.f32.gmra.mxu1 %vm245_vm0, %v217_v30  ;;  %v219_v47 = vmax.f32 %v169_v31, 0.0  ;;  %v171_v48 = vadd.f32 %v1165_v6, %v114_v32  ;;  %v116_v49 = vmul.f32 %v1159_v4, %v59_v37  ;;  %v220_v51 = vmax.f32 %v170_v35, 0.0  ;;  %v40_v20 = vld [vmem:[%s1722_s0 + $0xa0] sm:$0xff]  ;;  %v41_v32 = vld [vmem:[%s1722_s0 + $0xa8] sm:$0xff] }
  0x18   :  { %943 = vmatprep.mubr.msk.f32.mxu0 %vm245_vm0, %v192_v25  ;;  %982 = vmatprep.mubr.msk.f32.mxu1 %vm245_vm0, %v218_v34  ;;  %v172_v52 = vadd.f32 %v1165_v6, %v115_v41  ;;  %v117_v53 = vmul.f32 %v1159_v4, %v60_v42  ;;  %v195_v55 = vmax.f32 %v145_v39, 0.0  ;;  %v147_v56 = vadd.f32 %v1165_v6, %v90_v40  ;;  %v67_v40 = vld [vmem:[%s1722_s0 + $0x178] sm:$0xff] }
  0x19   :  { %v92_v57 = vmul.f32 %v1159_v4, %v35_v46  ;;  %v196_v59 = vmax.f32 %v146_v44, 0.0  ;;  %v148_v60 = vadd.f32 %v1165_v6, %v91_v45  ;;  %v93_v61 = vmul.f32 %v1159_v4, %v36_v50  ;;  %v68_v44 = vld [vmem:[%s1722_s0 + $0x180] sm:$0xff] }
  0x1a   :  { %v221_v63 = vmax.f32 %v171_v48, 0.0  ;;  %v173_v0 = vadd.f32 %v1165_v6, %v116_v49  ;;  %v118_v1 = vmul.f32 %v1159_v4, %v61_v54  ;;  %v222_v3 = vmax.f32 %v172_v52, 0.0  ;;  %v43_v48 = vld [vmem:[%s1722_s0 + $0xb8] sm:$0xff]  ;;  %v44_v52 = vld [vmem:[%s1722_s0 + $0xc0] sm:$0xff] }
  0x1b   :  { %944 = vmatmul.mubr.msk.f32.gmra.mxu0 %vm245_vm0, %v193_v38  ;;  %983 = vmatmul.mubr.msk.f32.gmra.mxu1 %vm245_vm0, %v219_v47  ;;  %v174_v5 = vadd.f32 %v1165_v6, %v117_v53  ;;  %v119_v7 = vmul.f32 %v1159_v4, %v62_v58  ;;  %v197_v9 = vmax.f32 %v147_v56, 0.0  ;;  %v149_v10 = vadd.f32 %v1165_v6, %v92_v57  ;;  %v69_v56 = vld [vmem:[%s1722_s0 + $0x188] sm:$0xff] }
  0x1c   :  { %946 = vmatprep.mubr.msk.f32.mxu0 %vm245_vm0, %v194_v43  ;;  %985 = vmatprep.mubr.msk.f32.mxu1 %vm245_vm0, %v220_v51  ;;  %v94_v11 = vmul.f32 %v1159_v4, %v37_v62  ;;  %v198_v13 = vmax.f32 %v148_v60, 0.0  ;;  %v150_v14 = vadd.f32 %v1165_v6, %v93_v61  ;;  %v95_v15 = vmul.f32 %v1159_v4, %v38_v2 }
  0x1d   :  { %v223_v17 = vmax.f32 %v173_v0, 0.0  ;;  %v175_v18 = vadd.f32 %v1165_v6, %v118_v1  ;;  %v120_v19 = vmul.f32 %v1159_v4, %v63_v8  ;;  %v224_v21 = vmax.f32 %v174_v5, 0.0 }
  0x1e   :  { %v176_v22 = vadd.f32 %v1165_v6, %v119_v7  ;;  %v121_v23 = vmul.f32 %v1159_v4, %v64_v12  ;;  %v199_v25 = vmax.f32 %v149_v10, 0.0  ;;  %v151_v26 = vadd.f32 %v1165_v6, %v94_v11 }
  0x1f   :  { %947 = vmatmul.mubr.msk.f32.gmra.mxu0 %vm245_vm0, %v195_v55  ;;  %986 = vmatmul.mubr.msk.f32.gmra.mxu1 %vm245_vm0, %v221_v63  ;;  %v96_v27 = vmul.f32 %v1159_v4, %v39_v16  ;;  %v200_v29 = vmax.f32 %v150_v14, 0.0  ;;  %v152_v30 = vadd.f32 %v1165_v6, %v95_v15  ;;  %v97_v31 = vmul.f32 %v1159_v4, %v40_v20  ;;  %v45_v63 = vld [vmem:[%s1722_s0 + $0xc8] sm:$0xff] }
  0x20   :  { %949 = vmatprep.mubr.msk.f32.mxu0 %vm245_vm0, %v196_v59  ;;  %988 = vmatprep.mubr.msk.f32.mxu1 %vm245_vm0, %v222_v3  ;;  %v225_v33 = vmax.f32 %v175_v18, 0.0  ;;  %v177_v34 = vadd.f32 %v1165_v6, %v120_v19  ;;  %v122_v35 = vmul.f32 %v1159_v4, %v65_v24  ;;  %v226_v37 = vmax.f32 %v176_v22, 0.0 }
  0x21   :  { %v178_v38 = vadd.f32 %v1165_v6, %v121_v23  ;;  %v123_v39 = vmul.f32 %v1159_v4, %v66_v28  ;;  %v201_v41 = vmax.f32 %v151_v26, 0.0  ;;  %v153_v42 = vadd.f32 %v1165_v6, %v96_v27 }
  0x22   :  { %v98_v43 = vmul.f32 %v1159_v4, %v41_v32  ;;  %v202_v45 = vmax.f32 %v152_v30, 0.0  ;;  %v154_v46 = vadd.f32 %v1165_v6, %v97_v31  ;;  %v99_v47 = vmul.f32 %v1159_v4, %v42_v36 }
  0x23   :  { %950 = vmatmul.mubr.msk.f32.gmra.mxu0 %vm245_vm0, %v197_v9  ;;  %989 = vmatmul.mubr.msk.f32.gmra.mxu1 %vm245_vm0, %v223_v17  ;;  %v227_v49 = vmax.f32 %v177_v34, 0.0  ;;  %v179_v50 = vadd.f32 %v1165_v6, %v122_v35  ;;  %v124_v51 = vmul.f32 %v1159_v4, %v67_v40  ;;  %v228_v53 = vmax.f32 %v178_v38, 0.0 }
  0x24   :  { %952 = vmatprep.mubr.msk.f32.mxu0 %vm245_vm0, %v198_v13  ;;  %991 = vmatprep.mubr.msk.f32.mxu1 %vm245_vm0, %v224_v21  ;;  %v180_v54 = vadd.f32 %v1165_v6, %v123_v39  ;;  %v125_v55 = vmul.f32 %v1159_v4, %v68_v44  ;;  %v203_v57 = vmax.f32 %v153_v42, 0.0  ;;  %v155_v58 = vadd.f32 %v1165_v6, %v98_v43 }
  0x25   :  { %v100_v59 = vmul.f32 %v1159_v4, %v43_v48  ;;  %v204_v60 = vmax.f32 %v154_v46, 0.0  ;;  %v156_v61 = vadd.f32 %v1165_v6, %v99_v47  ;;  %v101_v62 = vmul.f32 %v1159_v4, %v44_v52 }
  0x26   :  { %v229_v0 = vmax.f32 %v179_v50, 0.0  ;;  %v181_v1 = vadd.f32 %v1165_v6, %v124_v51  ;;  %v126_v2 = vmul.f32 %v1159_v4, %v69_v56  ;;  %v230_v3 = vmax.f32 %v180_v54, 0.0 }
  0x27   :  { %953 = vmatmul.mubr.msk.f32.gmra.mxu0 %vm245_vm0, %v199_v25  ;;  %992 = vmatmul.mubr.msk.f32.gmra.mxu1 %vm245_vm0, %v225_v33  ;;  %v182_v5 = vadd.f32 %v1165_v6, %v125_v55  ;;  %v205_v7 = vmax.f32 %v155_v58, 0.0  ;;  %v157_v8 = vadd.f32 %v1165_v6, %v100_v59  ;;  %v102_v9 = vmul.f32 %v1159_v4, %v45_v63 }
  0x28   :  { %955 = vmatprep.mubr.msk.f32.mxu0 %vm245_vm0, %v200_v29  ;;  %994 = vmatprep.mubr.msk.f32.mxu1 %vm245_vm0, %v226_v37  ;;  %v206_v10 = vmax.f32 %v156_v61, 0.0  ;;  %v158_v11 = vadd.f32 %v1165_v6, %v101_v62  ;;  %v231_v12 = vmax.f32 %v181_v1, 0.0  ;;  %v183_v13 = vadd.f32 %v1165_v6, %v126_v2 }
  0x29   :  { %v232_v14 = vmax.f32 %v182_v5, 0.0  ;;  %v207_v15 = vmax.f32 %v157_v8, 0.0  ;;  %v159_v16 = vadd.f32 %v1165_v6, %v102_v9  ;;  %v1469_v6 = vld [vmem:[%s1725_s4] ss:$0 sm:$0xff] }
  0x2a   :  { %v208_v4 = vmax.f32 %v158_v11, 0.0  ;;  %v233_v17 = vmax.f32 %v183_v13, 0.0 }
  0x2b   :  { %956 = vmatmul.mubr.msk.f32.gmra.mxu0 %vm245_vm0, %v201_v41  ;;  %995 = vmatmul.mubr.msk.f32.gmra.mxu1 %vm245_vm0, %v227_v49  ;;  %v209_v18 = vmax.f32 %v159_v16, 0.0 }
  0x2c   :  { %958 = vmatprep.mubr.msk.f32.mxu0 %vm245_vm0, %v202_v45  ;;  %997 = vmatprep.mubr.msk.f32.mxu1 %vm245_vm0, %v228_v53 }
  0x2f   :  { %959 = vmatmul.mubr.msk.f32.gmra.mxu0 %vm245_vm0, %v203_v57  ;;  %998 = vmatmul.mubr.msk.f32.gmra.mxu1 %vm245_vm0, %v229_v0 }
  0x30   :  { %961 = vmatprep.mubr.msk.f32.mxu0 %vm245_vm0, %v204_v60  ;;  %1000 = vmatprep.mubr.msk.f32.mxu1 %vm245_vm0, %v230_v3 }
  0x33   :  { %962 = vmatmul.mubr.msk.f32.gmra.mxu0 %vm245_vm0, %v205_v7  ;;  %1001 = vmatmul.mubr.msk.f32.gmra.mxu1 %vm245_vm0, %v231_v12 }
  0x34   :  { %964 = vmatprep.mubr.msk.f32.mxu0 %vm245_vm0, %v206_v10  ;;  %1003 = vmatprep.mubr.msk.f32.mxu1 %vm245_vm0, %v232_v14 }
  0x37   :  { %965 = vmatmul.mubr.msk.f32.gmra.mxu0 %vm245_vm0, %v207_v15  ;;  %1004 = vmatmul.mubr.msk.f32.gmra.mxu1 %vm245_vm0, %v233_v17 }
  0x38   :  { %967 = vmatprep.mubr.msk.f32.mxu0 %vm245_vm0, %v208_v4 }
  0x3b   :  { %968 = vmatmul.mubr.msk.f32.gmra.mxu0 %vm245_vm0, %v209_v18 }
  0xcb   :  { %v933_v19 = vpop.f32.mrf.mxu0  ;;  %v972_v22 = vpop.f32.mrf.mxu1 }
  0xcc   :  { %v468_v20 = vadd.f32 %v933_v19, %v1469_v6  ;;  %v598_v24 = vadd.f32 %v972_v22, %v1469_v6 }
  0xcd   :  { %v462_v21 = vpop.f32.mrf.mxu0  ;;  %v592_v26 = vpop.f32.mrf.mxu1 }
  0xce   :  { %1014 = vtanh.f32 %v468_v20  ;;  %v463_v23 = vadd.f32 %v1469_v6, %v462_v21  ;;  %v593_v28 = vadd.f32 %v1469_v6, %v592_v26 }
  0xcf   :  { %v936_v25 = vpop.f32.mrf.mxu0  ;;  %v975_v30 = vpop.f32.mrf.mxu1 }
  0xd0   :  { %1016 = vtanh.f32 %v463_v23  ;;  %v478_v27 = vadd.f32 %v936_v25, %v1469_v6  ;;  %v608_v32 = vadd.f32 %v975_v30, %v1469_v6 }
  0xd1   :  { %1018 = vtanh.f32 %v598_v24  ;;  %v472_v29 = vpop.f32.mrf.mxu0  ;;  %v602_v34 = vpop.f32.mrf.mxu1 }
  0xd2   :  { %1020 = vtanh.f32 %v478_v27  ;;  %v473_v31 = vadd.f32 %v1469_v6, %v472_v29  ;;  %v603_v36 = vadd.f32 %v1469_v6, %v602_v34 }
  0xd3   :  { %1022 = vtanh.f32 %v593_v28  ;;  %v939_v33 = vpop.f32.mrf.mxu0  ;;  %v978_v38 = vpop.f32.mrf.mxu1 }
  0xd4   :  { %1024 = vtanh.f32 %v473_v31  ;;  %v488_v35 = vadd.f32 %v939_v33, %v1469_v6  ;;  %v618_v40 = vadd.f32 %v978_v38, %v1469_v6 }
  0xd5   :  { %1026 = vtanh.f32 %v608_v32  ;;  %v482_v37 = vpop.f32.mrf.mxu0  ;;  %v612_v42 = vpop.f32.mrf.mxu1 }
  0xd6   :  { %1028 = vtanh.f32 %v488_v35  ;;  %v483_v39 = vadd.f32 %v1469_v6, %v482_v37  ;;  %v613_v44 = vadd.f32 %v1469_v6, %v612_v42 }
  0xd7   :  { %1030 = vtanh.f32 %v603_v36  ;;  %v942_v41 = vpop.f32.mrf.mxu0  ;;  %v981_v46 = vpop.f32.mrf.mxu1 }
  0xd8   :  { %1032 = vtanh.f32 %v483_v39  ;;  %v498_v43 = vadd.f32 %v942_v41, %v1469_v6  ;;  %v628_v48 = vadd.f32 %v981_v46, %v1469_v6 }
  0xd9   :  { %1034 = vtanh.f32 %v618_v40  ;;  %v492_v45 = vpop.f32.mrf.mxu0  ;;  %v622_v51 = vpop.f32.mrf.mxu1 }
  0xda   :  { %1036 = vtanh.f32 %v498_v43  ;;  %v493_v47 = vadd.f32 %v1469_v6, %v492_v45  ;;  %v623_v53 = vadd.f32 %v1469_v6, %v622_v51 }
  0xdb   :  { %v1015_v49 = vpop.eup %1014  ;;  %1038 = vtanh.f32 %v613_v44  ;;  %v945_v50 = vpop.f32.mrf.mxu0 }
  0xdc   :  { %763 = vst.msk [vmem:[%s1726_s5 + $0x8] sm:$0xff] %vm761_vm1, %v1015_v49  ;;  %1040 = vtanh.f32 %v493_v47  ;;  %v508_v52 = vadd.f32 %v945_v50, %v1469_v6  ;;  %v984_v56 = vpop.f32.mrf.mxu1 }
  0xdd   :  { %v1017_v54 = vpop.eup %1016  ;;  %1042 = vtanh.f32 %v628_v48  ;;  %v502_v55 = vpop.f32.mrf.mxu0  ;;  %v638_v59 = vadd.f32 %v984_v56, %v1469_v6 }
  0xde   :  { %v1019_v57 = vpop.eup %1018  ;;  %762 = vst.msk [vmem:[%s1726_s5] sm:$0xff] %vm761_vm1, %v1017_v54  ;;  %1044 = vtanh.f32 %v508_v52  ;;  %v503_v58 = vadd.f32 %v1469_v6, %v502_v55  ;;  %v632_v62 = vpop.f32.mrf.mxu1 }
  0xdf   :  { %v1021_v60 = vpop.eup %1020  ;;  %789 = vst.msk [vmem:[%s1726_s5 + $0xd8] sm:$0xff] %vm761_vm1, %v1019_v57  ;;  %1046 = vtanh.f32 %v623_v53  ;;  %v948_v61 = vpop.f32.mrf.mxu0  ;;  %v633_v1 = vadd.f32 %v1469_v6, %v632_v62 }
  0xe0   :  { %v1023_v63 = vpop.eup %1022  ;;  %765 = vst.msk [vmem:[%s1726_s5 + $0x18] sm:$0xff] %vm761_vm1, %v1021_v60  ;;  %1048 = vtanh.f32 %v503_v58  ;;  %v518_v0 = vadd.f32 %v948_v61, %v1469_v6  ;;  %v987_v5 = vpop.f32.mrf.mxu1 }
  0xe1   :  { %v1025_v2 = vpop.eup %1024  ;;  %788 = vst.msk [vmem:[%s1726_s5 + $0xd0] sm:$0xff] %vm761_vm1, %v1023_v63  ;;  %1050 = vtanh.f32 %v638_v59  ;;  %v512_v3 = vpop.f32.mrf.mxu0  ;;  %v648_v9 = vadd.f32 %v987_v5, %v1469_v6 }
  0xe2   :  { %v1027_v7 = vpop.eup %1026  ;;  %764 = vst.msk [vmem:[%s1726_s5 + $0x10] sm:$0xff] %vm761_vm1, %v1025_v2  ;;  %1052 = vtanh.f32 %v518_v0  ;;  %v513_v8 = vadd.f32 %v1469_v6, %v512_v3  ;;  %v642_v12 = vpop.f32.mrf.mxu1 }
  0xe3   :  { %v1029_v10 = vpop.eup %1028  ;;  %791 = vst.msk [vmem:[%s1726_s5 + $0xe8] sm:$0xff] %vm761_vm1, %v1027_v7  ;;  %1054 = vtanh.f32 %v633_v1  ;;  %v951_v11 = vpop.f32.mrf.mxu0  ;;  %v643_v15 = vadd.f32 %v1469_v6, %v642_v12 }
  0xe4   :  { %v1031_v13 = vpop.eup %1030  ;;  %767 = vst.msk [vmem:[%s1726_s5 + $0x28] sm:$0xff] %vm761_vm1, %v1029_v10  ;;  %1056 = vtanh.f32 %v513_v8  ;;  %v528_v14 = vadd.f32 %v951_v11, %v1469_v6  ;;  %v990_v17 = vpop.f32.mrf.mxu1 }
  0xe5   :  { %v1033_v16 = vpop.eup %1032  ;;  %790 = vst.msk [vmem:[%s1726_s5 + $0xe0] sm:$0xff] %vm761_vm1, %v1031_v13  ;;  %1058 = vtanh.f32 %v648_v9  ;;  %v522_v4 = vpop.f32.mrf.mxu0  ;;  %v658_v20 = vadd.f32 %v990_v17, %v1469_v6 }
  0xe6   :  { %v1035_v18 = vpop.eup %1034  ;;  %766 = vst.msk [vmem:[%s1726_s5 + $0x20] sm:$0xff] %vm761_vm1, %v1033_v16  ;;  %1060 = vtanh.f32 %v528_v14  ;;  %v523_v19 = vadd.f32 %v1469_v6, %v522_v4  ;;  %v652_v23 = vpop.f32.mrf.mxu1 }
  0xe7   :  { %v1037_v21 = vpop.eup %1036  ;;  %793 = vst.msk [vmem:[%s1726_s5 + $0xf8] sm:$0xff] %vm761_vm1, %v1035_v18  ;;  %1062 = vtanh.f32 %v643_v15  ;;  %v954_v22 = vpop.f32.mrf.mxu0  ;;  %v653_v26 = vadd.f32 %v1469_v6, %v652_v23 }
  0xe8   :  { %v1039_v24 = vpop.eup %1038  ;;  %769 = vst.msk [vmem:[%s1726_s5 + $0x38] sm:$0xff] %vm761_vm1, %v1037_v21  ;;  %1064 = vtanh.f32 %v523_v19  ;;  %v538_v25 = vadd.f32 %v954_v22, %v1469_v6  ;;  %v993_v29 = vpop.f32.mrf.mxu1 }
  0xe9   :  { %v1041_v27 = vpop.eup %1040  ;;  %792 = vst.msk [vmem:[%s1726_s5 + $0xf0] sm:$0xff] %vm761_vm1, %v1039_v24  ;;  %1066 = vtanh.f32 %v658_v20  ;;  %v532_v28 = vpop.f32.mrf.mxu0  ;;  %v668_v32 = vadd.f32 %v993_v29, %v1469_v6 }
  0xea   :  { %v1043_v30 = vpop.eup %1042  ;;  %768 = vst.msk [vmem:[%s1726_s5 + $0x30] sm:$0xff] %vm761_vm1, %v1041_v27  ;;  %1068 = vtanh.f32 %v538_v25  ;;  %v533_v31 = vadd.f32 %v1469_v6, %v532_v28  ;;  %v662_v35 = vpop.f32.mrf.mxu1 }
  0xeb   :  { %v1045_v33 = vpop.eup %1044  ;;  %795 = vst.msk [vmem:[%s1726_s5 + $0x108] sm:$0xff] %vm761_vm1, %v1043_v30  ;;  %1070 = vtanh.f32 %v653_v26  ;;  %v957_v34 = vpop.f32.mrf.mxu0  ;;  %v663_v38 = vadd.f32 %v1469_v6, %v662_v35 }
  0xec   :  { %v1047_v36 = vpop.eup %1046  ;;  %771 = vst.msk [vmem:[%s1726_s5 + $0x48] sm:$0xff] %vm761_vm1, %v1045_v33  ;;  %1072 = vtanh.f32 %v533_v31  ;;  %v548_v37 = vadd.f32 %v957_v34, %v1469_v6  ;;  %v996_v41 = vpop.f32.mrf.mxu1 }
  0xed   :  { %v1049_v39 = vpop.eup %1048  ;;  %794 = vst.msk [vmem:[%s1726_s5 + $0x100] sm:$0xff] %vm761_vm1, %v1047_v36  ;;  %1074 = vtanh.f32 %v668_v32  ;;  %v542_v40 = vpop.f32.mrf.mxu0  ;;  %v678_v44 = vadd.f32 %v996_v41, %v1469_v6 }
  0xee   :  { %v1051_v42 = vpop.eup %1050  ;;  %770 = vst.msk [vmem:[%s1726_s5 + $0x40] sm:$0xff] %vm761_vm1, %v1049_v39  ;;  %1076 = vtanh.f32 %v548_v37  ;;  %v543_v43 = vadd.f32 %v1469_v6, %v542_v40  ;;  %v672_v47 = vpop.f32.mrf.mxu1 }
  0xef   :  { %v1053_v45 = vpop.eup %1052  ;;  %797 = vst.msk [vmem:[%s1726_s5 + $0x118] sm:$0xff] %vm761_vm1, %v1051_v42  ;;  %1078 = vtanh.f32 %v663_v38  ;;  %v960_v46 = vpop.f32.mrf.mxu0  ;;  %v673_v50 = vadd.f32 %v1469_v6, %v672_v47 }
  0xf0   :  { %v1055_v48 = vpop.eup %1054  ;;  %773 = vst.msk [vmem:[%s1726_s5 + $0x58] sm:$0xff] %vm761_vm1, %v1053_v45  ;;  %1080 = vtanh.f32 %v543_v43  ;;  %v558_v49 = vadd.f32 %v960_v46, %v1469_v6  ;;  %v999_v53 = vpop.f32.mrf.mxu1 }
  0xf1   :  { %v1057_v51 = vpop.eup %1056  ;;  %796 = vst.msk [vmem:[%s1726_s5 + $0x110] sm:$0xff] %vm761_vm1, %v1055_v48  ;;  %1082 = vtanh.f32 %v678_v44  ;;  %v552_v52 = vpop.f32.mrf.mxu0  ;;  %v688_v56 = vadd.f32 %v999_v53, %v1469_v6 }
  0xf2   :  { %v1059_v54 = vpop.eup %1058  ;;  %772 = vst.msk [vmem:[%s1726_s5 + $0x50] sm:$0xff] %vm761_vm1, %v1057_v51  ;;  %1084 = vtanh.f32 %v558_v49  ;;  %v553_v55 = vadd.f32 %v1469_v6, %v552_v52  ;;  %v682_v59 = vpop.f32.mrf.mxu1 }
  0xf3   :  { %v1061_v57 = vpop.eup %1060  ;;  %799 = vst.msk [vmem:[%s1726_s5 + $0x128] sm:$0xff] %vm761_vm1, %v1059_v54  ;;  %1086 = vtanh.f32 %v673_v50  ;;  %v963_v58 = vpop.f32.mrf.mxu0  ;;  %v683_v62 = vadd.f32 %v1469_v6, %v682_v59 }
  0xf4   :  { %v1063_v60 = vpop.eup %1062  ;;  %775 = vst.msk [vmem:[%s1726_s5 + $0x68] sm:$0xff] %vm761_vm1, %v1061_v57  ;;  %1088 = vtanh.f32 %v553_v55  ;;  %v568_v61 = vadd.f32 %v963_v58, %v1469_v6  ;;  %v1002_v1 = vpop.f32.mrf.mxu1 }
  0xf5   :  { %v1065_v63 = vpop.eup %1064  ;;  %798 = vst.msk [vmem:[%s1726_s5 + $0x120] sm:$0xff] %vm761_vm1, %v1063_v60  ;;  %1090 = vtanh.f32 %v688_v56  ;;  %v562_v0 = vpop.f32.mrf.mxu0  ;;  %v698_v5 = vadd.f32 %v1002_v1, %v1469_v6 }
  0xf6   :  { %v1067_v2 = vpop.eup %1066  ;;  %774 = vst.msk [vmem:[%s1726_s5 + $0x60] sm:$0xff] %vm761_vm1, %v1065_v63  ;;  %1092 = vtanh.f32 %v568_v61  ;;  %v563_v3 = vadd.f32 %v1469_v6, %v562_v0  ;;  %v692_v9 = vpop.f32.mrf.mxu1 }
  0xf7   :  { %v1069_v7 = vpop.eup %1068  ;;  %801 = vst.msk [vmem:[%s1726_s5 + $0x138] sm:$0xff] %vm761_vm1, %v1067_v2  ;;  %1094 = vtanh.f32 %v683_v62  ;;  %v966_v8 = vpop.f32.mrf.mxu0  ;;  %v693_v12 = vadd.f32 %v1469_v6, %v692_v9 }
  0xf8   :  { %v1071_v10 = vpop.eup %1070  ;;  %777 = vst.msk [vmem:[%s1726_s5 + $0x78] sm:$0xff] %vm761_vm1, %v1069_v7  ;;  %1096 = vtanh.f32 %v563_v3  ;;  %v578_v11 = vadd.f32 %v966_v8, %v1469_v6  ;;  %v1005_v15 = vpop.f32.mrf.mxu1 }
  0xf9   :  { %v1073_v13 = vpop.eup %1072  ;;  %800 = vst.msk [vmem:[%s1726_s5 + $0x130] sm:$0xff] %vm761_vm1, %v1071_v10  ;;  %1098 = vtanh.f32 %v698_v5  ;;  %v572_v14 = vpop.f32.mrf.mxu0  ;;  %v708_v17 = vadd.f32 %v1005_v15, %v1469_v6 }
  0xfa   :  { %v1075_v16 = vpop.eup %1074  ;;  %776 = vst.msk [vmem:[%s1726_s5 + $0x70] sm:$0xff] %vm761_vm1, %v1073_v13  ;;  %1100 = vtanh.f32 %v578_v11  ;;  %v573_v4 = vadd.f32 %v1469_v6, %v572_v14  ;;  %v702_v20 = vpop.f32.mrf.mxu1 }
  0xfb   :  { %v1077_v18 = vpop.eup %1076  ;;  %803 = vst.msk [vmem:[%s1726_s5 + $0x148] sm:$0xff] %vm761_vm1, %v1075_v16  ;;  %1102 = vtanh.f32 %v693_v12  ;;  %v969_v19 = vpop.f32.mrf.mxu0  ;;  %v703_v23 = vadd.f32 %v1469_v6, %v702_v20 }
  0xfc   :  { %v1079_v21 = vpop.eup %1078  ;;  %779 = vst.msk [vmem:[%s1726_s5 + $0x88] sm:$0xff] %vm761_vm1, %v1077_v18  ;;  %1104 = vtanh.f32 %v573_v4  ;;  %v588_v22 = vadd.f32 %v969_v19, %v1469_v6 }
  0xfd   :  { %v1081_v24 = vpop.eup %1080  ;;  %802 = vst.msk [vmem:[%s1726_s5 + $0x140] sm:$0xff] %vm761_vm1, %v1079_v21  ;;  %1106 = vtanh.f32 %v708_v17  ;;  %v582_v25 = vpop.f32.mrf.mxu0 }
  0xfe   :  { %v1083_v26 = vpop.eup %1082  ;;  %778 = vst.msk [vmem:[%s1726_s5 + $0x80] sm:$0xff] %vm761_vm1, %v1081_v24  ;;  %1108 = vtanh.f32 %v588_v22  ;;  %v583_v27 = vadd.f32 %v1469_v6, %v582_v25 }
  0xff   :  { %v1085_v28 = vpop.eup %1084  ;;  %805 = vst.msk [vmem:[%s1726_s5 + $0x158] sm:$0xff] %vm761_vm1, %v1083_v26  ;;  %1110 = vtanh.f32 %v703_v23 }
 0x100   :  { %v1087_v29 = vpop.eup %1086  ;;  %781 = vst.msk [vmem:[%s1726_s5 + $0x98] sm:$0xff] %vm761_vm1, %v1085_v28  ;;  %1112 = vtanh.f32 %v583_v27 }
 0x101   :  { %v1089_v30 = vpop.eup %1088  ;;  %804 = vst.msk [vmem:[%s1726_s5 + $0x150] sm:$0xff] %vm761_vm1, %v1087_v29 }
 0x102   :  { %v1091_v6 = vpop.eup %1090  ;;  %780 = vst.msk [vmem:[%s1726_s5 + $0x90] sm:$0xff] %vm761_vm1, %v1089_v30 }
 0x103   :  { %v1093_v31 = vpop.eup %1092  ;;  %807 = vst.msk [vmem:[%s1726_s5 + $0x168] sm:$0xff] %vm761_vm1, %v1091_v6 }
 0x104   :  { %v1095_v32 = vpop.eup %1094  ;;  %783 = vst.msk [vmem:[%s1726_s5 + $0xa8] sm:$0xff] %vm761_vm1, %v1093_v31 }
 0x105   :  { %v1097_v33 = vpop.eup %1096  ;;  %806 = vst.msk [vmem:[%s1726_s5 + $0x160] sm:$0xff] %vm761_vm1, %v1095_v32 }
 0x106   :  { %v1099_v34 = vpop.eup %1098  ;;  %782 = vst.msk [vmem:[%s1726_s5 + $0xa0] sm:$0xff] %vm761_vm1, %v1097_v33 }
 0x107   :  { %v1101_v35 = vpop.eup %1100  ;;  %809 = vst.msk [vmem:[%s1726_s5 + $0x178] sm:$0xff] %vm761_vm1, %v1099_v34 }
 0x108   :  { %v1103_v36 = vpop.eup %1102  ;;  %785 = vst.msk [vmem:[%s1726_s5 + $0xb8] sm:$0xff] %vm761_vm1, %v1101_v35 }
 0x109   :  { %v1105_v37 = vpop.eup %1104  ;;  %808 = vst.msk [vmem:[%s1726_s5 + $0x170] sm:$0xff] %vm761_vm1, %v1103_v36 }
 0x10a   :  { %v1107_v38 = vpop.eup %1106  ;;  %784 = vst.msk [vmem:[%s1726_s5 + $0xb0] sm:$0xff] %vm761_vm1, %v1105_v37 }
 0x10b   :  { %v1109_v39 = vpop.eup %1108  ;;  %811 = vst.msk [vmem:[%s1726_s5 + $0x188] sm:$0xff] %vm761_vm1, %v1107_v38 }
 0x10c   :  { %v1111_v40 = vpop.eup %1110  ;;  %787 = vst.msk [vmem:[%s1726_s5 + $0xc8] sm:$0xff] %vm761_vm1, %v1109_v39 }
 0x10d   :  { %v1113_v41 = vpop.eup %1112  ;;  %810 = vst.msk [vmem:[%s1726_s5 + $0x180] sm:$0xff] %vm761_vm1, %v1111_v40 }
 0x10e   :  { %786 = vst.msk [vmem:[%s1726_s5 + $0xc0] sm:$0xff] %vm761_vm1, %v1113_v41 }

</bundles_post_ra>
